<compile_context>
chip_gen: v6e
topology: v6e:2x2x1
jax: 0.10.0
libtpu: 0.0.40
codegen_flags: <defaults>
</compile_context>

<pallas_src>
import numpy as np
import jax
import jax.numpy as jnp
from jax import lax
from jax.experimental import pallas as pl
from jax.experimental.pallas import tpu as pltpu


# ----------------------------------------------------------------------------
# Tree utilities (pure-Python port of the PyTorch script's Node / Tree classes)
# ----------------------------------------------------------------------------
class Node:
    def __init__(self, label, word=None):
        self.label = label
        self.word = word
        self.parent = None
        self.left = None
        self.right = None
        self.isLeaf = False


def getLeaves(node):
    if node is None:
        return []
    if node.isLeaf:
        return [node]
    return getLeaves(node.left) + getLeaves(node.right)


class Tree:
    def __init__(self, treeString, openChar='(', closeChar=')'):
        tokens = []
        self.open = '('
        self.close = ')'
        for toks in treeString.strip().split():
            tokens += list(toks)
        self.root = self.parse(tokens)

    def parse(self, tokens, parent=None):
        assert tokens[0] == self.open, 'Malformed tree'
        assert tokens[-1] == self.close, 'Malformed tree'
        split = 2
        countOpen = countClose = 0
        if tokens[split] == self.open:
            countOpen += 1
            split += 1
        while countOpen != countClose:
            if tokens[split] == self.open:
                countOpen += 1
            if tokens[split] == self.close:
                countClose += 1
            split += 1
        node = Node(int(tokens[1]))
        node.parent = parent
        if countOpen == 0:
            node.word = ''.join(tokens[2:-1]).lower()
            node.isLeaf = True
            return node
        node.left = self.parse(tokens[2:split], parent=node)
        node.right = self.parse(tokens[split:-1], parent=node)
        return node

    def get_words(self):
        return [n.word for n in getLeaves(self.root)]


# ----------------------------------------------------------------------------
# Host-side linearization: level-order batch across all trees.
# ----------------------------------------------------------------------------
def _ceil_to(x, m):
    return max(m, ((x + m - 1) // m) * m)


def build_batch(trees, word2index):
    """Flatten a batch of trees into level-ordered tables for the kernel."""
    leaf_words = []       # word id per leaf slot (in order of appearance)
    level_nodes = []      # level_nodes[l-1] = [(left_sym, right_sym), ...]
    post_slots = []       # symbolic slot per node in PyTorch output order
    post_table = []       # (word_id, left_post, right_post) for the numpy ref

    def visit(node):
        if node.isLeaf:
            wid = word2index.get(node.word, word2index['<UNK>'])
            sym = ('leaf', len(leaf_words))
            leaf_words.append(wid)
            post_table.append((wid, -1, -1))
            post_slots.append(sym)
            return sym, len(post_table) - 1, 0
        lsym, lpost, llev = visit(node.left)
        rsym, rpost, rlev = visit(node.right)
        lev = max(llev, rlev) + 1
        while len(level_nodes) < lev:
            level_nodes.append([])
        sym = ('internal', lev, len(level_nodes[lev - 1]))
        level_nodes[lev - 1].append((lsym, rsym))
        post_table.append((0, lpost, rpost))
        post_slots.append(sym)
        return sym, len(post_table) - 1, lev

    for t in trees:
        visit(t.root)

    n_leaf = len(leaf_words)
    n_levels = max(1, len(level_nodes))
    L_pad = _ceil_to(n_leaf, 8)
    max_lvl = max([len(lv) for lv in level_nodes] + [1])
    M_pad = _ceil_to(max_lvl, 8)
    num_slots = L_pad + n_levels * M_pad

    def resolve(sym):
        if sym[0] == 'leaf':
            return sym[1]
        _, lev, p = sym
        return L_pad + (lev - 1) * M_pad + p

    lidx = np.zeros((n_levels, M_pad), np.int32)   # padded rows point at slot 0
    ridx = np.zeros((n_levels, M_pad), np.int32)
    for l, lv in enumerate(level_nodes):
        for p, (ls, rs) in enumerate(lv):
            lidx[l, p] = resolve(ls)
            ridx[l, p] = resolve(rs)

    out_perm = np.array([resolve(s) for s in post_slots], np.int32)
    return dict(leaf_ids=np.array(leaf_words, np.int32),
                lidx=lidx.reshape(-1), ridx=ridx.reshape(-1),
                out_perm=out_perm, post_table=post_table,
                L_pad=L_pad, M_pad=M_pad, n_levels=n_levels,
                num_slots=num_slots)


# ----------------------------------------------------------------------------
# Pallas kernel
# ----------------------------------------------------------------------------
def _lane_tile(x, reps):
    """Tile x `reps` times along the last (lane) axis via log2 concats (VPU)."""
    out = x
    done = 1
    while done * 2 <= reps:
        out = jnp.concatenate([out, out], axis=-1)
        done *= 2
    if done < reps:
        out = jnp.concatenate([out] + [x] * (reps - done), axis=-1)
    return out


def rntn_kernel(lidx_ref, ridx_ref,                      # scalar-prefetch (SMEM)
                leafh_ref, vkt_ref, smat_ref, w_ref, b_ref,
                woutt_ref, bout_ref,                     # inputs (VMEM)
                out_ref,                                 # output (VMEM)
                hid_ref, lbuf_ref, rbuf_ref):            # scratch (VMEM)
    h = w_ref.shape[1]
    l_pad = leafh_ref.shape[0]
    m_pad = lbuf_ref.shape[0]
    n_levels = (hid_ref.shape[0] - l_pad) // m_pad

    # Leaves (pre-gathered embeddings) fill the bottom of the slot buffer.
    hid_ref[pl.ds(0, l_pad), :] = leafh_ref[...]

    def level_body(l, carry):
        # Gather this level's children rows from the VMEM-resident hid buffer.
        def gather(i, c):
            ls = lidx_ref[l * m_pad + i]
            rs = ridx_ref[l * m_pad + i]
            lbuf_ref[pl.ds(i, 1), :] = hid_ref[pl.ds(ls, 1), :]
            rbuf_ref[pl.ds(i, 1), :] = hid_ref[pl.ds(rs, 1), :]
            return c
        lax.fori_loop(0, m_pad, gather, None, unroll=True)

        c = jnp.concatenate([lbuf_ref[...], rbuf_ref[...]], axis=-1)  # (M, 2h)
        cb = c.astype(jnp.bfloat16)
        # vc[m, i*2h+j] = sum_k c[m,k] V[i,j,k]
        vc = jnp.dot(cb, vkt_ref[...], preferred_element_type=jnp.float32)
        # ct[m, i*2h+j] = c[m, j]   (lane tiling on the VPU, no one-hot matmul)
        ct = _lane_tile(c, h)
        # xVx[m, i] = c V_i c^T  (segment sum over j via the 0/1 matrix Sm)
        xvx = jnp.dot((vc * ct).astype(jnp.bfloat16), smat_ref[...],
                      preferred_element_type=jnp.float32)
        wx = jnp.dot(cb, w_ref[...], preferred_element_type=jnp.float32)
        newh = jnp.tanh(xvx + wx + b_ref[...])
        start = pl.multiple_of(l_pad + l * m_pad, 8)
        hid_ref[pl.ds(start, m_pad), :] = newh
        return carry

    lax.fori_loop(0, n_levels, level_body, None)

    # Fused classifier epilogue: log_softmax(hid @ W_out^T + b_out).
    # Class axis padded to 128 lanes; pad columns carry a -1e9 bias so they
    # contribute exp() == 0 and never affect the real columns.
    logits = jnp.dot(hid_ref[...].astype(jnp.bfloat16), woutt_ref[...],
                     preferred_element_type=jnp.float32) + bout_ref[...]
    m = jnp.max(logits, axis=1, keepdims=True)
    z = logits - m
    lse = jnp.log(jnp.sum(jnp.exp(z), axis=1, keepdims=True))
    out_ref[...] = z - lse


# ----------------------------------------------------------------------------
# Wrapper
# ----------------------------------------------------------------------------
OUT_PAD = 128   # lane-dense padded class axis


def rntn_forward(batch, embed, V, W, b, WoutT, bout, output_size):
    h = embed.shape[1]
    two_h = 2 * h
    L_pad, M_pad = batch['L_pad'], batch['M_pad']
    num_slots = batch['num_slots']

    # Leaf embeddings pre-gathered in JAX: VMEM use is O(batch), not O(vocab).
    leaf_ids = jnp.asarray(batch['leaf_ids'])
    leaf_h = jnp.zeros((L_pad, h), jnp.float32)
    leaf_h = leaf_h.at[:leaf_ids.shape[0]].set(jnp.take(embed, leaf_ids, axis=0))

    # Parameter re-layouts (host-side); MXU operands in bf16.
    VcT = jnp.transpose(V, (2, 0, 1)).reshape(two_h, h * two_h)   # [k, i*2h+j]
    VcT = VcT.astype(jnp.bfloat16)
    Sm_np = np.zeros((h * two_h, h), np.float32)
    for i in range(h):
        Sm_np[i * two_h:(i + 1) * two_h, i] = 1.0
    Sm = jnp.asarray(Sm_np, jnp.bfloat16)
    Wb = W.astype(jnp.bfloat16)
    Wout_pad = jnp.zeros((h, OUT_PAD), jnp.bfloat16)
    Wout_pad = Wout_pad.at[:, :output_size].set(WoutT.astype(jnp.bfloat16))
    bout_pad = jnp.full((1, OUT_PAD), -1e9, jnp.float32)
    bout_pad = bout_pad.at[:, :output_size].set(bout)

    lidx = jnp.asarray(batch['lidx'])
    ridx = jnp.asarray(batch['ridx'])

    fullmap = lambda i, l_tab, r_tab: (0, 0)
    spec = lambda shape: pl.BlockSpec(shape, fullmap)

    logp_pad = pl.pallas_call(
        rntn_kernel,
        out_shape=jax.ShapeDtypeStruct((num_slots, OUT_PAD), jnp.float32),
        grid_spec=pltpu.PrefetchScalarGridSpec(
            num_scalar_prefetch=2,
            grid=(1,),
            in_specs=[spec(leaf_h.shape), spec(VcT.shape), spec(Sm.shape),
                      spec(Wb.shape), spec(b.shape), spec(Wout_pad.shape),
                      spec(bout_pad.shape)],
            out_specs=spec((num_slots, OUT_PAD)),
            scratch_shapes=[pltpu.VMEM((num_slots, h), jnp.float32),
                            pltpu.VMEM((M_pad, h), jnp.float32),
                            pltpu.VMEM((M_pad, h), jnp.float32)],
        ),
        compiler_params=pltpu.CompilerParams(
            dimension_semantics=("arbitrary",)),
    )(lidx, ridx, leaf_h, VcT, Sm, Wb, b, Wout_pad, bout_pad)

    # Back to PyTorch ordering (post-order per tree, trees concatenated) and
    # drop the padded class columns — plain JAX glue.
    out_perm = jnp.asarray(batch['out_perm'])
    return jnp.take(logp_pad, out_perm, axis=0)[:, :output_size]


# ----------------------------------------------------------------------------
# Pure numpy (float64) reference mirroring the PyTorch semantics.
# ----------------------------------------------------------------------------
def reference_forward(post_table, embed, V, W, b, WoutT, bout):
    embed, V, W, b, WoutT, bout = [np.asarray(x, dtype=np.float64)
                                   for x in (embed, V, W, b, WoutT, bout)]
    h = embed.shape[1]
    hid = []
    for wid, l, r in post_table:
        if l < 0:
            cur = embed[wid:wid + 1, :]
        else:
            c = np.concatenate([hid[l], hid[r]], axis=1)        # (1, 2h)
            xvx = np.array([(c @ V[i] @ c.T)[0, 0] for i in range(h)]
                           ).reshape(1, h)
            cur = np.tanh(xvx + c @ W + b)
        hid.append(cur)
    H = np.concatenate(hid, axis=0)
    logits = H @ WoutT + bout
    m = logits.max(axis=1, keepdims=True)
    z = logits - m
    return z - np.log(np.exp(z).sum(axis=1, keepdims=True))


# ----------------------------------------------------------------------------
if __name__ == "__main__":
    hidden_size = 32
    output_size = 5

    # TODO(synk): tree parsing / recursion stays on the host (dynamic Python
    # object graphs have no Pallas equivalent); it is flattened into level-
    # ordered int32 tables consumed by the kernel via scalar prefetch.
    tree_strs = [
        "(3 (2 (2 the) (2 movie)) (4 (3 (2 was) (3 great)) (2 .)))",
        "(1 (2 it) (1 (2 was) (1 terrible)))",
    ]
    trees = [Tree(s) for s in tree_strs]

    word2index = {'<UNK>': 0}
    for tr in trees:
        for w in tr.get_words():
            if w not in word2index:
                word2index[w] = len(word2index)
    vocab = len(word2index)

    batch = build_batch(trees, word2index)
    num_nodes = len(batch['out_perm'])

    # Deterministic synthetic parameters (shapes from RNTN.__init__; scale is
    # roughly Xavier, matching RNTN.init_weight).
    key = jax.random.PRNGKey(0)
    k1, k2, k3, k4, k5, k6 = jax.random.split(key, 6)
    scale = 0.1
    h, two_h = hidden_size, 2 * hidden_size
    embed = scale * jax.random.normal(k1, (vocab, h), jnp.float32)
    V = scale * jax.random.normal(k2, (h, two_h, two_h), jnp.float32)
    W = scale * jax.random.normal(k3, (two_h, h), jnp.float32)
    b = scale * jax.random.normal(k4, (1, h), jnp.float32)
    WoutT = scale * jax.random.normal(k5, (h, output_size), jnp.float32)  # W_out.weight^T
    bout = scale * jax.random.normal(k6, (1, output_size), jnp.float32)

    logp = rntn_forward(batch, embed, V, W, b, WoutT, bout, output_size)
    logp = jax.block_until_ready(logp)

    ref = reference_forward(batch['post_table'], embed, V, W, b, WoutT, bout)
    np.testing.assert_allclose(np.asarray(logp), ref, rtol=1e-2, atol=1e-2)
    assert logp.shape == (num_nodes, output_size)

    print("KERNEL_OK")
</pallas_src>

<mosaic_0001>
module attributes {stable_mosaic.version = 11 : i64} {
  func.func @rntn_kernel(%arg0: i32, %arg1: memref<24xi32, #tpu.memory_space<smem>>, %arg2: memref<24xi32, #tpu.memory_space<smem>>, %arg3: memref<8x32xf32, #tpu.memory_space<vmem>>, %arg4: memref<64x2048xbf16, #tpu.memory_space<vmem>>, %arg5: memref<2048x32xbf16, #tpu.memory_space<vmem>>, %arg6: memref<64x32xbf16, #tpu.memory_space<vmem>>, %arg7: memref<1x32xf32, #tpu.memory_space<vmem>>, %arg8: memref<32x128xbf16, #tpu.memory_space<vmem>>, %arg9: memref<1x128xf32, #tpu.memory_space<vmem>>, %arg10: memref<32x128xf32, #tpu.memory_space<vmem>>, %arg11: memref<32x32xf32, #tpu.memory_space<vmem>>, %arg12: memref<8x32xf32, #tpu.memory_space<vmem>>, %arg13: memref<8x32xf32, #tpu.memory_space<vmem>>) attributes {dimension_semantics = [#tpu.dimension_semantics<arbitrary>], iteration_bounds = array<i64: 1>, scalar_prefetch = 2 : i64, scratch_operands = 3 : i64, tpu.core_type = #tpu.core_type<tc>, window_params = [{pipeline_mode = #tpu.pipeline_mode<synchronous>, transform_indices = @transform_0, window_bounds = array<i64: 8, 32>}, {pipeline_mode = #tpu.pipeline_mode<synchronous>, transform_indices = @transform_1, window_bounds = array<i64: 64, 2048>}, {pipeline_mode = #tpu.pipeline_mode<synchronous>, transform_indices = @transform_2, window_bounds = array<i64: 2048, 32>}, {pipeline_mode = #tpu.pipeline_mode<synchronous>, transform_indices = @transform_3, window_bounds = array<i64: 64, 32>}, {pipeline_mode = #tpu.pipeline_mode<synchronous>, transform_indices = @transform_4, window_bounds = array<i64: 1, 32>}, {pipeline_mode = #tpu.pipeline_mode<synchronous>, transform_indices = @transform_5, window_bounds = array<i64: 32, 128>}, {pipeline_mode = #tpu.pipeline_mode<synchronous>, transform_indices = @transform_6, window_bounds = array<i64: 1, 128>}, {pipeline_mode = #tpu.pipeline_mode<synchronous>, transform_indices = @transform_7, window_bounds = array<i64: 32, 128>}]} {
    %c0 = arith.constant 0 : index
    %c0_0 = arith.constant 0 : index
    %0 = vector.load %arg3[%c0, %c0_0] : memref<8x32xf32, #tpu.memory_space<vmem>>, vector<8x32xf32>
    %c0_1 = arith.constant 0 : index
    %c0_2 = arith.constant 0 : index
    %1 = vector.load %arg11[%c0_1, %c0_2] : memref<32x32xf32, #tpu.memory_space<vmem>>, vector<8x32xf32>
    tpu.vector_store %arg11[%c0_1, %c0_2], %0 {strides = array<i32>} : memref<32x32xf32, #tpu.memory_space<vmem>>, vector<8x32xf32>,
    %c0_i32 = arith.constant 0 : i32
    %c3_i32 = arith.constant 3 : i32
    %2 = arith.addi %c0_i32, %c3_i32 : i32
    %c1_i32 = arith.constant 1 : i32
    scf.for %arg14 = %c0_i32 to %2 step %c1_i32  : i32 {
      %c0_i32_14 = arith.constant 0 : i32
      %c8_i32 = arith.constant 8 : i32
      %21 = arith.muli %arg14, %c8_i32 : i32
      %22 = arith.addi %21, %c0_i32_14 : i32
      %23 = arith.index_cast %22 : i32 to index
      %24 = memref.load %arg1[%23] : memref<24xi32, #tpu.memory_space<smem>>
      %c8_i32_15 = arith.constant 8 : i32
      %25 = arith.muli %arg14, %c8_i32_15 : i32
      %26 = arith.addi %25, %c0_i32_14 : i32
      %27 = arith.index_cast %26 : i32 to index
      %28 = memref.load %arg2[%27] : memref<24xi32, #tpu.memory_space<smem>>
      %29 = arith.index_cast %24 : i32 to index
      %c0_16 = arith.constant 0 : index
      %30 = vector.load %arg11[%29, %c0_16] : memref<32x32xf32, #tpu.memory_space<vmem>>, vector<1x32xf32>
      %31 = arith.index_cast %c0_i32_14 : i32 to index
      %c0_17 = arith.constant 0 : index
      %32 = vector.load %arg12[%31, %c0_17] : memref<8x32xf32, #tpu.memory_space<vmem>>, vector<1x32xf32>
      tpu.vector_store %arg12[%31, %c0_17], %30 {strides = array<i32>} : memref<8x32xf32, #tpu.memory_space<vmem>>, vector<1x32xf32>,
      %33 = arith.index_cast %28 : i32 to index
      %c0_18 = arith.constant 0 : index
      %34 = vector.load %arg11[%33, %c0_18] : memref<32x32xf32, #tpu.memory_space<vmem>>, vector<1x32xf32>
      %35 = arith.index_cast %c0_i32_14 : i32 to index
      %c0_19 = arith.constant 0 : index
      %36 = vector.load %arg13[%35, %c0_19] : memref<8x32xf32, #tpu.memory_space<vmem>>, vector<1x32xf32>
      tpu.vector_store %arg13[%35, %c0_19], %34 {strides = array<i32>} : memref<8x32xf32, #tpu.memory_space<vmem>>, vector<1x32xf32>,
      %c1_i32_20 = arith.constant 1 : i32
      %c8_i32_21 = arith.constant 8 : i32
      %37 = arith.muli %arg14, %c8_i32_21 : i32
      %38 = arith.addi %37, %c1_i32_20 : i32
      %39 = arith.index_cast %38 : i32 to index
      %40 = memref.load %arg1[%39] : memref<24xi32, #tpu.memory_space<smem>>
      %c8_i32_22 = arith.constant 8 : i32
      %41 = arith.muli %arg14, %c8_i32_22 : i32
      %42 = arith.addi %41, %c1_i32_20 : i32
      %43 = arith.index_cast %42 : i32 to index
      %44 = memref.load %arg2[%43] : memref<24xi32, #tpu.memory_space<smem>>
      %45 = arith.index_cast %40 : i32 to index
      %c0_23 = arith.constant 0 : index
      %46 = vector.load %arg11[%45, %c0_23] : memref<32x32xf32, #tpu.memory_space<vmem>>, vector<1x32xf32>
      %47 = arith.index_cast %c1_i32_20 : i32 to index
      %c0_24 = arith.constant 0 : index
      %48 = vector.load %arg12[%47, %c0_24] : memref<8x32xf32, #tpu.memory_space<vmem>>, vector<1x32xf32>
      tpu.vector_store %arg12[%47, %c0_24], %46 {strides = array<i32>} : memref<8x32xf32, #tpu.memory_space<vmem>>, vector<1x32xf32>,
      %49 = arith.index_cast %44 : i32 to index
      %c0_25 = arith.constant 0 : index
      %50 = vector.load %arg11[%49, %c0_25] : memref<32x32xf32, #tpu.memory_space<vmem>>, vector<1x32xf32>
      %51 = arith.index_cast %c1_i32_20 : i32 to index
      %c0_26 = arith.constant 0 : index
      %52 = vector.load %arg13[%51, %c0_26] : memref<8x32xf32, #tpu.memory_space<vmem>>, vector<1x32xf32>
      tpu.vector_store %arg13[%51, %c0_26], %50 {strides = array<i32>} : memref<8x32xf32, #tpu.memory_space<vmem>>, vector<1x32xf32>,
      %c2_i32 = arith.constant 2 : i32
      %c8_i32_27 = arith.constant 8 : i32
      %53 = arith.muli %arg14, %c8_i32_27 : i32
      %54 = arith.addi %53, %c2_i32 : i32
      %55 = arith.index_cast %54 : i32 to index
      %56 = memref.load %arg1[%55] : memref<24xi32, #tpu.memory_space<smem>>
      %c8_i32_28 = arith.constant 8 : i32
      %57 = arith.muli %arg14, %c8_i32_28 : i32
      %58 = arith.addi %57, %c2_i32 : i32
      %59 = arith.index_cast %58 : i32 to index
      %60 = memref.load %arg2[%59] : memref<24xi32, #tpu.memory_space<smem>>
      %61 = arith.index_cast %56 : i32 to index
      %c0_29 = arith.constant 0 : index
      %62 = vector.load %arg11[%61, %c0_29] : memref<32x32xf32, #tpu.memory_space<vmem>>, vector<1x32xf32>
      %63 = arith.index_cast %c2_i32 : i32 to index
      %c0_30 = arith.constant 0 : index
      %64 = vector.load %arg12[%63, %c0_30] : memref<8x32xf32, #tpu.memory_space<vmem>>, vector<1x32xf32>
      tpu.vector_store %arg12[%63, %c0_30], %62 {strides = array<i32>} : memref<8x32xf32, #tpu.memory_space<vmem>>, vector<1x32xf32>,
      %65 = arith.index_cast %60 : i32 to index
      %c0_31 = arith.constant 0 : index
      %66 = vector.load %arg11[%65, %c0_31] : memref<32x32xf32, #tpu.memory_space<vmem>>, vector<1x32xf32>
      %67 = arith.index_cast %c2_i32 : i32 to index
      %c0_32 = arith.constant 0 : index
      %68 = vector.load %arg13[%67, %c0_32] : memref<8x32xf32, #tpu.memory_space<vmem>>, vector<1x32xf32>
      tpu.vector_store %arg13[%67, %c0_32], %66 {strides = array<i32>} : memref<8x32xf32, #tpu.memory_space<vmem>>, vector<1x32xf32>,
      %c3_i32_33 = arith.constant 3 : i32
      %c8_i32_34 = arith.constant 8 : i32
      %69 = arith.muli %arg14, %c8_i32_34 : i32
      %70 = arith.addi %69, %c3_i32_33 : i32
      %71 = arith.index_cast %70 : i32 to index
      %72 = memref.load %arg1[%71] : memref<24xi32, #tpu.memory_space<smem>>
      %c8_i32_35 = arith.constant 8 : i32
      %73 = arith.muli %arg14, %c8_i32_35 : i32
      %74 = arith.addi %73, %c3_i32_33 : i32
      %75 = arith.index_cast %74 : i32 to index
      %76 = memref.load %arg2[%75] : memref<24xi32, #tpu.memory_space<smem>>
      %77 = arith.index_cast %72 : i32 to index
      %c0_36 = arith.constant 0 : index
      %78 = vector.load %arg11[%77, %c0_36] : memref<32x32xf32, #tpu.memory_space<vmem>>, vector<1x32xf32>
      %79 = arith.index_cast %c3_i32_33 : i32 to index
      %c0_37 = arith.constant 0 : index
      %80 = vector.load %arg12[%79, %c0_37] : memref<8x32xf32, #tpu.memory_space<vmem>>, vector<1x32xf32>
      tpu.vector_store %arg12[%79, %c0_37], %78 {strides = array<i32>} : memref<8x32xf32, #tpu.memory_space<vmem>>, vector<1x32xf32>,
      %81 = arith.index_cast %76 : i32 to index
      %c0_38 = arith.constant 0 : index
      %82 = vector.load %arg11[%81, %c0_38] : memref<32x32xf32, #tpu.memory_space<vmem>>, vector<1x32xf32>
      %83 = arith.index_cast %c3_i32_33 : i32 to index
      %c0_39 = arith.constant 0 : index
      %84 = vector.load %arg13[%83, %c0_39] : memref<8x32xf32, #tpu.memory_space<vmem>>, vector<1x32xf32>
      tpu.vector_store %arg13[%83, %c0_39], %82 {strides = array<i32>} : memref<8x32xf32, #tpu.memory_space<vmem>>, vector<1x32xf32>,
      %c4_i32 = arith.constant 4 : i32
      %c8_i32_40 = arith.constant 8 : i32
      %85 = arith.muli %arg14, %c8_i32_40 : i32
      %86 = arith.addi %85, %c4_i32 : i32
      %87 = arith.index_cast %86 : i32 to index
      %88 = memref.load %arg1[%87] : memref<24xi32, #tpu.memory_space<smem>>
      %c8_i32_41 = arith.constant 8 : i32
      %89 = arith.muli %arg14, %c8_i32_41 : i32
      %90 = arith.addi %89, %c4_i32 : i32
      %91 = arith.index_cast %90 : i32 to index
      %92 = memref.load %arg2[%91] : memref<24xi32, #tpu.memory_space<smem>>
      %93 = arith.index_cast %88 : i32 to index
      %c0_42 = arith.constant 0 : index
      %94 = vector.load %arg11[%93, %c0_42] : memref<32x32xf32, #tpu.memory_space<vmem>>, vector<1x32xf32>
      %95 = arith.index_cast %c4_i32 : i32 to index
      %c0_43 = arith.constant 0 : index
      %96 = vector.load %arg12[%95, %c0_43] : memref<8x32xf32, #tpu.memory_space<vmem>>, vector<1x32xf32>
      tpu.vector_store %arg12[%95, %c0_43], %94 {strides = array<i32>} : memref<8x32xf32, #tpu.memory_space<vmem>>, vector<1x32xf32>,
      %97 = arith.index_cast %92 : i32 to index
      %c0_44 = arith.constant 0 : index
      %98 = vector.load %arg11[%97, %c0_44] : memref<32x32xf32, #tpu.memory_space<vmem>>, vector<1x32xf32>
      %99 = arith.index_cast %c4_i32 : i32 to index
      %c0_45 = arith.constant 0 : index
      %100 = vector.load %arg13[%99, %c0_45] : memref<8x32xf32, #tpu.memory_space<vmem>>, vector<1x32xf32>
      tpu.vector_store %arg13[%99, %c0_45], %98 {strides = array<i32>} : memref<8x32xf32, #tpu.memory_space<vmem>>, vector<1x32xf32>,
      %c5_i32 = arith.constant 5 : i32
      %c8_i32_46 = arith.constant 8 : i32
      %101 = arith.muli %arg14, %c8_i32_46 : i32
      %102 = arith.addi %101, %c5_i32 : i32
      %103 = arith.index_cast %102 : i32 to index
      %104 = memref.load %arg1[%103] : memref<24xi32, #tpu.memory_space<smem>>
      %c8_i32_47 = arith.constant 8 : i32
      %105 = arith.muli %arg14, %c8_i32_47 : i32
      %106 = arith.addi %105, %c5_i32 : i32
      %107 = arith.index_cast %106 : i32 to index
      %108 = memref.load %arg2[%107] : memref<24xi32, #tpu.memory_space<smem>>
      %109 = arith.index_cast %104 : i32 to index
      %c0_48 = arith.constant 0 : index
      %110 = vector.load %arg11[%109, %c0_48] : memref<32x32xf32, #tpu.memory_space<vmem>>, vector<1x32xf32>
      %111 = arith.index_cast %c5_i32 : i32 to index
      %c0_49 = arith.constant 0 : index
      %112 = vector.load %arg12[%111, %c0_49] : memref<8x32xf32, #tpu.memory_space<vmem>>, vector<1x32xf32>
      tpu.vector_store %arg12[%111, %c0_49], %110 {strides = array<i32>} : memref<8x32xf32, #tpu.memory_space<vmem>>, vector<1x32xf32>,
      %113 = arith.index_cast %108 : i32 to index
      %c0_50 = arith.constant 0 : index
      %114 = vector.load %arg11[%113, %c0_50] : memref<32x32xf32, #tpu.memory_space<vmem>>, vector<1x32xf32>
      %115 = arith.index_cast %c5_i32 : i32 to index
      %c0_51 = arith.constant 0 : index
      %116 = vector.load %arg13[%115, %c0_51] : memref<8x32xf32, #tpu.memory_space<vmem>>, vector<1x32xf32>
      tpu.vector_store %arg13[%115, %c0_51], %114 {strides = array<i32>} : memref<8x32xf32, #tpu.memory_space<vmem>>, vector<1x32xf32>,
      %c6_i32 = arith.constant 6 : i32
      %c8_i32_52 = arith.constant 8 : i32
      %117 = arith.muli %arg14, %c8_i32_52 : i32
      %118 = arith.addi %117, %c6_i32 : i32
      %119 = arith.index_cast %118 : i32 to index
      %120 = memref.load %arg1[%119] : memref<24xi32, #tpu.memory_space<smem>>
      %c8_i32_53 = arith.constant 8 : i32
      %121 = arith.muli %arg14, %c8_i32_53 : i32
      %122 = arith.addi %121, %c6_i32 : i32
      %123 = arith.index_cast %122 : i32 to index
      %124 = memref.load %arg2[%123] : memref<24xi32, #tpu.memory_space<smem>>
      %125 = arith.index_cast %120 : i32 to index
      %c0_54 = arith.constant 0 : index
      %126 = vector.load %arg11[%125, %c0_54] : memref<32x32xf32, #tpu.memory_space<vmem>>, vector<1x32xf32>
      %127 = arith.index_cast %c6_i32 : i32 to index
      %c0_55 = arith.constant 0 : index
      %128 = vector.load %arg12[%127, %c0_55] : memref<8x32xf32, #tpu.memory_space<vmem>>, vector<1x32xf32>
      tpu.vector_store %arg12[%127, %c0_55], %126 {strides = array<i32>} : memref<8x32xf32, #tpu.memory_space<vmem>>, vector<1x32xf32>,
      %129 = arith.index_cast %124 : i32 to index
      %c0_56 = arith.constant 0 : index
      %130 = vector.load %arg11[%129, %c0_56] : memref<32x32xf32, #tpu.memory_space<vmem>>, vector<1x32xf32>
      %131 = arith.index_cast %c6_i32 : i32 to index
      %c0_57 = arith.constant 0 : index
      %132 = vector.load %arg13[%131, %c0_57] : memref<8x32xf32, #tpu.memory_space<vmem>>, vector<1x32xf32>
      tpu.vector_store %arg13[%131, %c0_57], %130 {strides = array<i32>} : memref<8x32xf32, #tpu.memory_space<vmem>>, vector<1x32xf32>,
      %c7_i32 = arith.constant 7 : i32
      %c8_i32_58 = arith.constant 8 : i32
      %133 = arith.muli %arg14, %c8_i32_58 : i32
      %134 = arith.addi %133, %c7_i32 : i32
      %135 = arith.index_cast %134 : i32 to index
      %136 = memref.load %arg1[%135] : memref<24xi32, #tpu.memory_space<smem>>
      %c8_i32_59 = arith.constant 8 : i32
      %137 = arith.muli %arg14, %c8_i32_59 : i32
      %138 = arith.addi %137, %c7_i32 : i32
      %139 = arith.index_cast %138 : i32 to index
      %140 = memref.load %arg2[%139] : memref<24xi32, #tpu.memory_space<smem>>
      %141 = arith.index_cast %136 : i32 to index
      %c0_60 = arith.constant 0 : index
      %142 = vector.load %arg11[%141, %c0_60] : memref<32x32xf32, #tpu.memory_space<vmem>>, vector<1x32xf32>
      %143 = arith.index_cast %c7_i32 : i32 to index
      %c0_61 = arith.constant 0 : index
      %144 = vector.load %arg12[%143, %c0_61] : memref<8x32xf32, #tpu.memory_space<vmem>>, vector<1x32xf32>
      tpu.vector_store %arg12[%143, %c0_61], %142 {strides = array<i32>} : memref<8x32xf32, #tpu.memory_space<vmem>>, vector<1x32xf32>,
      %145 = arith.index_cast %140 : i32 to index
      %c0_62 = arith.constant 0 : index
      %146 = vector.load %arg11[%145, %c0_62] : memref<32x32xf32, #tpu.memory_space<vmem>>, vector<1x32xf32>
      %147 = arith.index_cast %c7_i32 : i32 to index
      %c0_63 = arith.constant 0 : index
      %148 = vector.load %arg13[%147, %c0_63] : memref<8x32xf32, #tpu.memory_space<vmem>>, vector<1x32xf32>
      tpu.vector_store %arg13[%147, %c0_63], %146 {strides = array<i32>} : memref<8x32xf32, #tpu.memory_space<vmem>>, vector<1x32xf32>,
      %c8_i32_64 = arith.constant 8 : i32
      %c0_65 = arith.constant 0 : index
      %c0_66 = arith.constant 0 : index
      %149 = vector.load %arg12[%c0_65, %c0_66] : memref<8x32xf32, #tpu.memory_space<vmem>>, vector<8x32xf32>
      %c0_67 = arith.constant 0 : index
      %c0_68 = arith.constant 0 : index
      %150 = vector.load %arg13[%c0_67, %c0_68] : memref<8x32xf32, #tpu.memory_space<vmem>>, vector<8x32xf32>
      %151 = tpu.concatenate %149, %150 in 1 : vector<8x32xf32>, vector<8x32xf32> -> vector<8x64xf32>
      %152 = arith.truncf %151 : vector<8x64xf32> to vector<8x64xbf16>
      %c0_69 = arith.constant 0 : index
      %c0_70 = arith.constant 0 : index
      %153 = vector.load %arg4[%c0_69, %c0_70] : memref<64x2048xbf16, #tpu.memory_space<vmem>>, vector<64x2048xbf16>
      %cst_71 = arith.constant dense<0.000000e+00> : vector<8x2048xf32>
      %154 = tpu.matmul %152, %153, %cst_71 {dimension_numbers = #tpu.dot_dimension_numbers<[1], [0], [0], [1], [0, 0, 1, 1], [], []>} : vector<8x64xbf16>, vector<64x2048xbf16>, vector<8x2048xf32> -> vector<8x2048xf32>
      %155 = tpu.concatenate %151, %151 in 1 : vector<8x64xf32>, vector<8x64xf32> -> vector<8x128xf32>
      %156 = tpu.concatenate %155, %155 in 1 : vector<8x128xf32>, vector<8x128xf32> -> vector<8x256xf32>
      %157 = tpu.concatenate %156, %156 in 1 : vector<8x256xf32>, vector<8x256xf32> -> vector<8x512xf32>
      %158 = tpu.concatenate %157, %157 in 1 : vector<8x512xf32>, vector<8x512xf32> -> vector<8x1024xf32>
      %159 = tpu.concatenate %158, %158 in 1 : vector<8x1024xf32>, vector<8x1024xf32> -> vector<8x2048xf32>
      %160 = arith.mulf %154, %159 : vector<8x2048xf32>
      %161 = arith.truncf %160 : vector<8x2048xf32> to vector<8x2048xbf16>
      %c0_72 = arith.constant 0 : index
      %c0_73 = arith.constant 0 : index
      %162 = vector.load %arg5[%c0_72, %c0_73] : memref<2048x32xbf16, #tpu.memory_space<vmem>>, vector<2048x32xbf16>
      %cst_74 = arith.constant dense<0.000000e+00> : vector<8x32xf32>
      %163 = tpu.matmul %161, %162, %cst_74 {dimension_numbers = #tpu.dot_dimension_numbers<[1], [0], [0], [1], [0, 0, 1, 1], [], []>} : vector<8x2048xbf16>, vector<2048x32xbf16>, vector<8x32xf32> -> vector<8x32xf32>
      %c0_75 = arith.constant 0 : index
      %c0_76 = arith.constant 0 : index
      %164 = vector.load %arg6[%c0_75, %c0_76] : memref<64x32xbf16, #tpu.memory_space<vmem>>, vector<64x32xbf16>
      %cst_77 = arith.constant dense<0.000000e+00> : vector<8x32xf32>
      %165 = tpu.matmul %152, %164, %cst_77 {dimension_numbers = #tpu.dot_dimension_numbers<[1], [0], [0], [1], [0, 0, 1, 1], [], []>} : vector<8x64xbf16>, vector<64x32xbf16>, vector<8x32xf32> -> vector<8x32xf32>
      %166 = arith.addf %163, %165 : vector<8x32xf32>
      %c0_78 = arith.constant 0 : index
      %c0_79 = arith.constant 0 : index
      %167 = vector.load %arg7[%c0_78, %c0_79] : memref<1x32xf32, #tpu.memory_space<vmem>>, vector<1x32xf32>
      %168 = vector.broadcast %167 : vector<1x32xf32> to vector<8x32xf32>
      %169 = arith.addf %166, %168 : vector<8x32xf32>
      %170 = math.tanh %169 : vector<8x32xf32>
      %c8_i32_80 = arith.constant 8 : i32
      %171 = arith.muli %arg14, %c8_i32_80 : i32
      %c8_i32_81 = arith.constant 8 : i32
      %172 = arith.addi %c8_i32_81, %171 : i32
      %173 = tpu.assume_multiple %172, 8 : i32
      %174 = arith.index_cast %173 : i32 to index
      %c0_82 = arith.constant 0 : index
      %175 = vector.load %arg11[%174, %c0_82] : memref<32x32xf32, #tpu.memory_space<vmem>>, vector<8x32xf32>
      tpu.vector_store %arg11[%174, %c0_82], %170 {strides = array<i32>} : memref<32x32xf32, #tpu.memory_space<vmem>>, vector<8x32xf32>,
    }
    %c3_i32_3 = arith.constant 3 : i32
    %c0_4 = arith.constant 0 : index
    %c0_5 = arith.constant 0 : index
    %3 = vector.load %arg11[%c0_4, %c0_5] : memref<32x32xf32, #tpu.memory_space<vmem>>, vector<32x32xf32>
    %4 = arith.truncf %3 : vector<32x32xf32> to vector<32x32xbf16>
    %c0_6 = arith.constant 0 : index
    %c0_7 = arith.constant 0 : index
    %5 = vector.load %arg8[%c0_6, %c0_7] : memref<32x128xbf16, #tpu.memory_space<vmem>>, vector<32x128xbf16>
    %cst = arith.constant dense<0.000000e+00> : vector<32x128xf32>
    %6 = tpu.matmul %4, %5, %cst {dimension_numbers = #tpu.dot_dimension_numbers<[1], [0], [0], [1], [0, 0, 1, 1], [], []>} : vector<32x32xbf16>, vector<32x128xbf16>, vector<32x128xf32> -> vector<32x128xf32>
    %c0_8 = arith.constant 0 : index
    %c0_9 = arith.constant 0 : index
    %7 = vector.load %arg9[%c0_8, %c0_9] : memref<1x128xf32, #tpu.memory_space<vmem>>, vector<1x128xf32>
    %8 = vector.broadcast %7 : vector<1x128xf32> to vector<32x128xf32>
    %9 = arith.addf %6, %8 : vector<32x128xf32>
    %cst_10 = arith.constant dense<0xFF800000> : vector<32xf32>
    %10 = vector.multi_reduction <maximumf>, %9, %cst_10 [1] : vector<32x128xf32> to vector<32xf32>
    %11 = vector.shape_cast %10 : vector<32xf32> to vector<32x1xf32>
    %12 = vector.broadcast %11 : vector<32x1xf32> to vector<32x128xf32>
    %13 = arith.subf %9, %12 : vector<32x128xf32>
    %14 = math.exp %13 : vector<32x128xf32>
    %cst_11 = arith.constant dense<0.000000e+00> : vector<32xf32>
    %15 = vector.multi_reduction <add>, %14, %cst_11 [1] : vector<32x128xf32> to vector<32xf32>
    %16 = vector.shape_cast %15 : vector<32xf32> to vector<32x1xf32>
    %17 = math.log %16 : vector<32x1xf32>
    %18 = vector.broadcast %17 : vector<32x1xf32> to vector<32x128xf32>
    %19 = arith.subf %13, %18 : vector<32x128xf32>
    %c0_12 = arith.constant 0 : index
    %c0_13 = arith.constant 0 : index
    %20 = vector.load %arg10[%c0_12, %c0_13] : memref<32x128xf32, #tpu.memory_space<vmem>>, vector<32x128xf32>
    tpu.vector_store %arg10[%c0_12, %c0_13], %19 {strides = array<i32>} : memref<32x128xf32, #tpu.memory_space<vmem>>, vector<32x128xf32>,
    return
  }
  func.func @transform_0(%arg0: i32, %arg1: memref<24xi32, #tpu.memory_space<smem>>, %arg2: memref<24xi32, #tpu.memory_space<smem>>) -> (i32, i32) {
    %c0_i32 = arith.constant 0 : i32
    %c0_i32_0 = arith.constant 0 : i32
    %c0_i32_1 = arith.constant 0 : i32
    return %c0_i32, %c0_i32_0 : i32, i32
  }
  func.func @transform_1(%arg0: i32, %arg1: memref<24xi32, #tpu.memory_space<smem>>, %arg2: memref<24xi32, #tpu.memory_space<smem>>) -> (i32, i32) {
    %c0_i32 = arith.constant 0 : i32
    %c0_i32_0 = arith.constant 0 : i32
    %c0_i32_1 = arith.constant 0 : i32
    return %c0_i32, %c0_i32_0 : i32, i32
  }
  func.func @transform_2(%arg0: i32, %arg1: memref<24xi32, #tpu.memory_space<smem>>, %arg2: memref<24xi32, #tpu.memory_space<smem>>) -> (i32, i32) {
    %c0_i32 = arith.constant 0 : i32
    %c0_i32_0 = arith.constant 0 : i32
    %c0_i32_1 = arith.constant 0 : i32
    return %c0_i32, %c0_i32_0 : i32, i32
  }
  func.func @transform_3(%arg0: i32, %arg1: memref<24xi32, #tpu.memory_space<smem>>, %arg2: memref<24xi32, #tpu.memory_space<smem>>) -> (i32, i32) {
    %c0_i32 = arith.constant 0 : i32
    %c0_i32_0 = arith.constant 0 : i32
    %c0_i32_1 = arith.constant 0 : i32
    return %c0_i32, %c0_i32_0 : i32, i32
  }
  func.func @transform_4(%arg0: i32, %arg1: memref<24xi32, #tpu.memory_space<smem>>, %arg2: memref<24xi32, #tpu.memory_space<smem>>) -> (i32, i32) {
    %c0_i32 = arith.constant 0 : i32
    %c0_i32_0 = arith.constant 0 : i32
    %c0_i32_1 = arith.constant 0 : i32
    return %c0_i32, %c0_i32_0 : i32, i32
  }
  func.func @transform_5(%arg0: i32, %arg1: memref<24xi32, #tpu.memory_space<smem>>, %arg2: memref<24xi32, #tpu.memory_space<smem>>) -> (i32, i32) {
    %c0_i32 = arith.constant 0 : i32
    %c0_i32_0 = arith.constant 0 : i32
    %c0_i32_1 = arith.constant 0 : i32
    return %c0_i32, %c0_i32_0 : i32, i32
  }
  func.func @transform_6(%arg0: i32, %arg1: memref<24xi32, #tpu.memory_space<smem>>, %arg2: memref<24xi32, #tpu.memory_space<smem>>) -> (i32, i32) {
    %c0_i32 = arith.constant 0 : i32
    %c0_i32_0 = arith.constant 0 : i32
    %c0_i32_1 = arith.constant 0 : i32
    return %c0_i32, %c0_i32_0 : i32, i32
  }
  func.func @transform_7(%arg0: i32, %arg1: memref<24xi32, #tpu.memory_space<smem>>, %arg2: memref<24xi32, #tpu.memory_space<smem>>) -> (i32, i32) {
    %c0_i32 = arith.constant 0 : i32
    %c0_i32_0 = arith.constant 0 : i32
    %c0_i32_1 = arith.constant 0 : i32
    return %c0_i32, %c0_i32_0 : i32, i32
  }
}

</mosaic_0001>

<bundles_post_ra>
// kernel: tpu_custom_call.1
= control target key start
LH: loop header
LB: loop body
LE: loop exit
PB: predicated region body
PF: predicated region fallthrough
CT: control target
= control target key end

     0   :  { %s4001_s0 = inlined_call_operand.vmem [shape: s32[24], index: 0, kind: input, shape index: {}]   ;;  %s4002_s2 = inlined_call_operand.vmem [shape: f32[8,32], index: 2, kind: input, shape index: {}]   ;;  %s4003_s3 = inlined_call_operand.vmem [shape: bf16[64,2048], index: 3, kind: input, shape index: {}]   ;;  %s4004_s4 = inlined_call_operand.vmem [shape: bf16[2048,32], index: 4, kind: input, shape index: {}]   ;;  %s4005_s5 = inlined_call_operand.vmem [shape: bf16[64,32], index: 5, kind: input, shape index: {}]   ;;  %s4006_s6 = inlined_call_operand.vmem [shape: f32[1,32], index: 6, kind: input, shape index: {}]   ;;  %s4007_s7 = inlined_call_operand.vmem [shape: bf16[32,128], index: 7, kind: input, shape index: {}]   ;;  %s4008_s8 = inlined_call_operand.vmem [shape: f32[1,128], index: 8, kind: input, shape index: {}]   ;;  %s4009_s9 = inlined_call_operand.hbm [shape: f32[32,128], index: 9, kind: output, shape index: {}]   ;;  %s4010_s1 = inlined_call_operand.vmem [shape: s32[24], index: 1, kind: input, shape index: {}]  }
   0x1   :  { %s14_s11 = sshll.u32 %s4001_s0, 4  ;;  %s18_s14 = sshll.u32 %s4010_s1, 4  ;;  %s15_s11 = int_to_ptr.vmem [resolvable:$true] %s14_s11  ;;  %s19_s14 = int_to_ptr.vmem [resolvable:$true] %s18_s14 }
   0x2   :  { %s3068_s15 = scalar_lea.vmem %s15_s11, 16  ;;  %p3073_p1 = scmp.lt.s32.totalorder %s15_s11, %s15_s11 }
   0x3   :  { %p3069_p0 = scmp.ne.s32.totalorder %s15_s11, %s3068_s15  ;;  %p3074_p2 = scmp.lt.s32.totalorder %s3068_s15, %s3068_s15 }
   0x5   :  { %p3075_p3 = por %p3074_p2, %p3073_p1 }
   0x7   :  { %p3076_p4 = pnand %p3075_p3, %p3069_p0 }
   0x9   :  { %3079 = shalt.err (!%p3076_p4)  }
   0xa   :  { %s3124_s16 = smov [#allocation6]   ;;  %s3080_s17 = scalar_lea.vmem %s19_s14, 16 }
   0xb   :  { %17 = dma.vmem_to_smem %s15_s11, 16, %s3124_s16, [#allocation5] }
   0xc   :  { %p3081_p5 = scmp.ne.s32.totalorder %s19_s14, %s3080_s17  ;;  %p3085_p6 = scmp.lt.s32.totalorder %s19_s14, %s19_s14 }
   0xd   :  { %p3086_p7 = scmp.lt.s32.totalorder %s3080_s17, %s3080_s17 }
   0xf   :  { %p3087_p8 = por %p3086_p7, %p3085_p6 }
  0x11   :  { %p3088_p9 = pnand %p3087_p8, %p3081_p5 }
  0x13   :  { %3091 = shalt.err (!%p3088_p9)  }
  0x14   :  { %s3125_s0 = smov [#allocation7]  }
  0x15   :  { %21 = dma.vmem_to_smem %s19_s14, 16, %s3125_s0, [#allocation5] }
  0x16   :  { %3116 = dma.done.wait [#allocation5], 32 }
  0x17   :  { %3117 = vsyncadd [#allocation5], 4294967264 }
  0x18   :  { %23 = sfence }
  0x19   :  { %24 = vsyncpa [#allocation9], 0  ;;  %v40_v0 = vld [vmem:[%s4002_s2] sm:$0xff]  ;;  %vm41_vm0 = vcmask 261120   ;;  %s3194_s19 = smov 0  }
  0x1a   :  { %42 = vst.msk [vmem:[#allocation2] sm:$0xff] %vm41_vm0, %v40_v0 }
  0x1b LB: > { %v178_v1 = vld [vmem:[%s4003_s3 + $0x180] sm:$0xff]  ;;  %v179_v3 = vld [vmem:[%s4003_s3 + $0x188] sm:$0xff]  ;;  %s3218_s10 = sshll.u32 %s3122_s19, 3  ;;  %vm54_vm1 = vcmask 253952   ;;  %v3314_v37 = vld [vmem:[%s4003_s3 + $0x190] sm:$0xff]  ;;  %v3126_v48 = vmov 0   ;;  %s3122_s19 = sphi %s3194_s19, %s48_s19  }
  0x1c   : > { %v186_v2 = vld [vmem:[%s4003_s3 + $0x1c0] sm:$0xff]  ;;  %v187_v5 = vld [vmem:[%s4003_s3 + $0x1c8] sm:$0xff]  ;;  %s3230_s17 = sld [smem:[#allocation7 + %s3218_s10]]  ;;  %s59_s0 = sadd.s32 1, %s3218_s10  ;;  %v3319_v38 = vld [vmem:[%s4003_s3 + $0x1d0] sm:$0xff]  ;;  %550 = vmatprep.mubr.bf16.mxu0 %v3126_v48  ;;  %591 = vmatprep.mubr.bf16.mxu1 %v3126_v48  ;;  %vm514_vm2 = vcmask 523264  }
  0x1d   : > { %v2529_v4 = vcombine.high %v178_v1, %v186_v2  ;;  %v2528_v6 = vcombine.low %v178_v1, %v186_v2  ;;  %v162_v7 = vld [vmem:[%s4003_s3 + $0x100] sm:$0xff]  ;;  %v2531_v9 = vcombine.high %v179_v3, %v187_v5  ;;  %v2530_v10 = vcombine.low %v179_v3, %v187_v5  ;;  %v163_v12 = vld [vmem:[%s4003_s3 + $0x108] sm:$0xff]  ;;  %s3244_s2 = sld [smem:[#allocation7 + %s59_s0]]  ;;  %s68_s24 = sadd.s32 2, %s3218_s10  ;;  %v3332_v41 = vld [vmem:[%s4003_s3 + $0x198] sm:$0xff] }
  0x1e   : > { %v170_v8 = vld [vmem:[%s4003_s3 + $0x140] sm:$0xff]  ;;  %v171_v13 = vld [vmem:[%s4003_s3 + $0x148] sm:$0xff]  ;;  %s3259_s29 = sld [smem:[#allocation7 + %s68_s24]]  ;;  %s77_s30 = sadd.s32 3, %s3218_s10  ;;  %v2533_v40 = vcombine.high %v3314_v37, %v3319_v38  ;;  %v3337_v42 = vld [vmem:[%s4003_s3 + $0x1d8] sm:$0xff]  ;;  %v2532_v44 = vcombine.low %v3314_v37, %v3319_v38  ;;  %vm3130_vm3 = vmmov 0  }
  0x1f   : > { %v2513_v11 = vcombine.high %v162_v7, %v170_v8  ;;  %v146_v14 = vld [vmem:[%s4003_s3 + $0x80] sm:$0xff]  ;;  %526 = vmatprep.subr.bf16.mxu0 %v2529_v4  ;;  %v2515_v15 = vcombine.high %v163_v12, %v171_v13  ;;  %v147_v17 = vld [vmem:[%s4003_s3 + $0x88] sm:$0xff]  ;;  %567 = vmatprep.subr.bf16.mxu1 %v2531_v9  ;;  %v2512_v19 = vcombine.low %v162_v7, %v170_v8  ;;  %s3272_s15 = sld [smem:[#allocation7 + %s77_s30]]  ;;  %s86_s16 = sadd.s32 4, %s3218_s10  ;;  %v164_v60 = vld [vmem:[%s4003_s3 + $0x110] sm:$0xff] }
  0x20   : > { %v154_v16 = vld [vmem:[%s4003_s3 + $0xc0] sm:$0xff]  ;;  %v155_v18 = vld [vmem:[%s4003_s3 + $0xc8] sm:$0xff]  ;;  %527 = vmatpush1.bf16.msra.mxu0 %v2528_v6  ;;  %568 = vmatpush1.bf16.msra.mxu1 %v2530_v10  ;;  %v2514_v22 = vcombine.low %v163_v12, %v171_v13  ;;  %s3277_s1 = sld [smem:[#allocation7 + %s86_s16]]  ;;  %s95_s18 = sadd.s32 5, %s3218_s10  ;;  %v2534_v45 = vcombine.low %v3332_v41, %v3337_v42  ;;  %v2535_v46 = vcombine.high %v3332_v41, %v3337_v42  ;;  %v172_v61 = vld [vmem:[%s4003_s3 + $0x150] sm:$0xff] }
  0x21   : > { %v3250_v20 = vld [vmem:[%s4003_s3] sm:$0xff]  ;;  %528 = vmatprep.subr.bf16.mxu0 %v2513_v11  ;;  %v2497_v23 = vcombine.high %v146_v14, %v154_v16  ;;  %v3265_v24 = vld [vmem:[%s4003_s3 + $0x8] sm:$0xff]  ;;  %569 = vmatprep.subr.bf16.mxu1 %v2515_v15  ;;  %v2499_v26 = vcombine.high %v147_v17, %v155_v18  ;;  %s3282_s20 = sld [smem:[#allocation7 + %s95_s18]]  ;;  %s104_s21 = sadd.s32 6, %s3218_s10  ;;  %v2496_v27 = vcombine.low %v146_v14, %v154_v16  ;;  %v165_v62 = vld [vmem:[%s4003_s3 + $0x118] sm:$0xff] }
  0x22   : > { %v3255_v21 = vld [vmem:[%s4003_s3 + $0x40] sm:$0xff]  ;;  %v139_v25 = vld [vmem:[%s4003_s3 + $0x48] sm:$0xff]  ;;  %s3287_s22 = sld [smem:[#allocation7 + %s104_s21]]  ;;  %v2498_v28 = vcombine.low %v147_v17, %v155_v18  ;;  %s56_s23 = scalar_lea.vmem [#allocation2], %s3230_s17  ;;  %v173_v63 = vld [vmem:[%s4003_s3 + $0x158] sm:$0xff]  ;;  %v2517_v3 = vcombine.high %v164_v60, %v172_v61  ;;  %v2516_v9 = vcombine.low %v164_v60, %v172_v61 }
  0x23   : > { %v2481_v29 = vcombine.high %v3250_v20, %v3255_v21  ;;  %v57_v30 = vld [vmem:[%s56_s23] sm:$0x1]  ;;  %s113_s25 = sadd.s32 7, %s3218_s10  ;;  %v2483_v31 = vcombine.high %v3265_v24, %v139_v25  ;;  %s65_s26 = scalar_lea.vmem [#allocation2], %s3244_s2  ;;  %v2480_v34 = vcombine.low %v3250_v20, %v3255_v21  ;;  %v2482_v36 = vcombine.low %v3265_v24, %v139_v25  ;;  %v148_v5 = vld [vmem:[%s4003_s3 + $0x90] sm:$0xff]  ;;  %v149_v7 = vld [vmem:[%s4003_s3 + $0x98] sm:$0xff] }
  0x24   : > { %529 = vmatpush1.bf16.msra.mxu0 %v2512_v19  ;;  %570 = vmatpush1.bf16.msra.mxu1 %v2514_v22  ;;  %58 = vst.msk [vmem:[#allocation4] sm:$0x1] %vm54_vm1, %v57_v30  ;;  %v66_v32 = vld [vmem:[%s65_s26] sm:$0x1]  ;;  %s3298_s27 = sld [smem:[#allocation7 + %s113_s25]]  ;;  %s74_s28 = scalar_lea.vmem [#allocation2], %s3259_s29  ;;  %v2519_v4 = vcombine.high %v165_v62, %v173_v63  ;;  %v2518_v10 = vcombine.low %v165_v62, %v173_v63 }
  0x25   : > { %530 = vmatprep.subr.bf16.mxu0 %v2497_v23  ;;  %571 = vmatprep.subr.bf16.mxu1 %v2499_v26  ;;  %67 = vst.msk [vmem:[#allocation4 + $0x1] sm:$0x1] %vm54_vm1, %v66_v32  ;;  %v75_v33 = vld [vmem:[%s74_s28] sm:$0x1]  ;;  %s83_s17 = scalar_lea.vmem [#allocation2], %s3272_s15  ;;  %s3309_s2 = sld [smem:[#allocation6 + %s59_s0]] }
  0x26   : > { %76 = vst.msk [vmem:[#allocation4 + $0x2] sm:$0x1] %vm54_vm1, %v75_v33  ;;  %v84_v35 = vld [vmem:[%s83_s17] sm:$0x1]  ;;  %s92_s14 = scalar_lea.vmem [#allocation2], %s3277_s1  ;;  %s3325_s0 = sld [smem:[#allocation6 + %s68_s24]] }
  0x27   : > { %85 = vst.msk [vmem:[#allocation4 + $0x3] sm:$0x1] %vm54_vm1, %v84_v35  ;;  %v93_v39 = vld [vmem:[%s92_s14] sm:$0x1]  ;;  %s101_s1 = scalar_lea.vmem [#allocation2], %s3282_s20  ;;  %s3343_s24 = sld [smem:[#allocation6 + %s77_s30]] }
  0x28   : > { %531 = vmatpush1.bf16.msra.mxu0 %v2496_v27  ;;  %572 = vmatpush1.bf16.msra.mxu1 %v2498_v28  ;;  %94 = vst.msk [vmem:[#allocation4 + $0x4] sm:$0x1] %vm54_vm1, %v93_v39  ;;  %v102_v43 = vld [vmem:[%s101_s1] sm:$0x1]  ;;  %s110_s17 = scalar_lea.vmem [#allocation2], %s3287_s22  ;;  %s87_s30 = sld [smem:[#allocation6 + %s86_s16]] }
  0x29   : > { %532 = vmatprep.subr.bf16.mxu0 %v2481_v29  ;;  %573 = vmatprep.subr.bf16.mxu1 %v2483_v31  ;;  %103 = vst.msk [vmem:[#allocation4 + $0x5] sm:$0x1] %vm54_vm1, %v102_v43  ;;  %v111_v47 = vld [vmem:[%s110_s17] sm:$0x1]  ;;  %s96_s20 = sld [smem:[#allocation6 + %s95_s18]]  ;;  %s3127_s14 = smov 32  }
  0x2a   : > { %112 = vst.msk [vmem:[#allocation4 + $0x6] sm:$0x1] %vm54_vm1, %v111_v47  ;;  %s119_s22 = scalar_lea.vmem [#allocation2], %s3298_s27  ;;  %s105_s29 = sld [smem:[#allocation6 + %s104_s21]]  ;;  %v156_v6 = vld [vmem:[%s4003_s3 + $0xd0] sm:$0xff]  ;;  %v157_v8 = vld [vmem:[%s4003_s3 + $0xd8] sm:$0xff] }
  0x2b   : > { %v120_v49 = vld [vmem:[%s119_s22] sm:$0x1]  ;;  %s114_s16 = sld [smem:[#allocation6 + %s113_s25]]  ;;  %s62_s11 = scalar_lea.vmem [#allocation2], %s3309_s2  ;;  %v2501_v11 = vcombine.high %v148_v5, %v156_v6  ;;  %v2503_v12 = vcombine.high %v149_v7, %v157_v8  ;;  %v132_v13 = vld [vmem:[%s4003_s3 + $0x10] sm:$0xff]  ;;  %v133_v15 = vld [vmem:[%s4003_s3 + $0x18] sm:$0xff]  ;;  %v2500_v17 = vcombine.low %v148_v5, %v156_v6  ;;  %v2502_v18 = vcombine.low %v149_v7, %v157_v8 }
  0x2c   : > { %533 = vmatpush1.bf16.msra.mxu0 %v2480_v34  ;;  %574 = vmatpush1.bf16.msra.mxu1 %v2482_v36  ;;  %121 = vst.msk [vmem:[#allocation4 + $0x7] sm:$0x1] %vm54_vm1, %v120_v49  ;;  %v63_v50 = vld [vmem:[%s62_s11] sm:$0x1]  ;;  %s50_s12 = sld [smem:[#allocation6 + %s3218_s10]]  ;;  %s71_s13 = scalar_lea.vmem [#allocation2], %s3325_s0 }
  0x2d   : > { %608 = vmatprep.subr.bf16.mxu0 %v2533_v40  ;;  %649 = vmatprep.subr.bf16.mxu1 %v2535_v46  ;;  %64 = vst.msk [vmem:[#allocation3 + $0x1] sm:$0x1] %vm54_vm1, %v63_v50  ;;  %v72_v51 = vld [vmem:[%s71_s13] sm:$0x1]  ;;  %s80_s18 = scalar_lea.vmem [#allocation2], %s3343_s24  ;;  %v140_v14 = vld [vmem:[%s4003_s3 + $0x50] sm:$0xff] }
  0x2e   : > { %73 = vst.msk [vmem:[#allocation3 + $0x2] sm:$0x1] %vm54_vm1, %v72_v51  ;;  %v81_v52 = vld [vmem:[%s80_s18] sm:$0x1]  ;;  %s89_s21 = scalar_lea.vmem [#allocation2], %s87_s30  ;;  %v141_v16 = vld [vmem:[%s4003_s3 + $0x58] sm:$0xff]  ;;  %v2485_v19 = vcombine.high %v132_v13, %v140_v14  ;;  %v2484_v25 = vcombine.low %v132_v13, %v140_v14 }
  0x2f   : > { %82 = vst.msk [vmem:[#allocation3 + $0x3] sm:$0x1] %vm54_vm1, %v81_v52  ;;  %v90_v53 = vld [vmem:[%s89_s21] sm:$0x1]  ;;  %s98_s27 = scalar_lea.vmem [#allocation2], %s96_s20  ;;  %s3128_s20 = smov 64   ;;  %v2487_v20 = vcombine.high %v133_v15, %v141_v16  ;;  %v2486_v26 = vcombine.low %v133_v15, %v141_v16 }
  0x30   : > { %91 = vst.msk [vmem:[#allocation3 + $0x4] sm:$0x1] %vm54_vm1, %v90_v53  ;;  %v99_v54 = vld [vmem:[%s98_s27] sm:$0x1]  ;;  %s107_s25 = scalar_lea.vmem [#allocation2], %s105_s29  ;;  %v183_v23 = vld [vmem:[%s4003_s3 + $0x1a8] sm:$0xff] }
  0x31   : > { %100 = vst.msk [vmem:[#allocation3 + $0x5] sm:$0x1] %vm54_vm1, %v99_v54  ;;  %v108_v55 = vld [vmem:[%s107_s25] sm:$0x1]  ;;  %s116_s2 = scalar_lea.vmem [#allocation2], %s114_s16  ;;  %v191_v24 = vld [vmem:[%s4003_s3 + $0x1e8] sm:$0xff] }
  0x32   : > { %109 = vst.msk [vmem:[#allocation3 + $0x6] sm:$0x1] %vm54_vm1, %v108_v55  ;;  %v117_v57 = vld [vmem:[%s116_s2] sm:$0x1]  ;;  %s52_s0 = scalar_lea.vmem [#allocation2], %s50_s12  ;;  %v2539_v28 = vcombine.high %v183_v23, %v191_v24  ;;  %v167_v31 = vld [vmem:[%s4003_s3 + $0x128] sm:$0xff]  ;;  %v2538_v34 = vcombine.low %v183_v23, %v191_v24 }
  0x33   : > { %v123_v56 = vld [vmem:[#allocation4] sm:$0xff]  ;;  %118 = vst.msk [vmem:[#allocation3 + $0x7] sm:$0x1] %vm54_vm1, %v117_v57  ;;  %v53_v58 = vld [vmem:[%s52_s0] sm:$0x1]  ;;  %v184_v54 = vld [vmem:[%s4003_s3 + $0x1b0] sm:$0xff] }
  0x34   : > { %125 = vrot.lane.b32.xlu0 %v123_v56, %s3127_s14  ;;  %55 = vst.msk [vmem:[#allocation3] sm:$0x1] %vm54_vm1, %v53_v58  ;;  %v182_v21 = vld [vmem:[%s4003_s3 + $0x1a0] sm:$0xff]  ;;  %v175_v32 = vld [vmem:[%s4003_s3 + $0x168] sm:$0xff]  ;;  %v192_v55 = vld [vmem:[%s4003_s3 + $0x1f0] sm:$0xff]  ;;  %s2472_s28 = scalar_lea.vmem [#allocation2], %s3218_s10 }
  0x35   : > { %v190_v22 = vld [vmem:[%s4003_s3 + $0x1e0] sm:$0xff]  ;;  %v2523_v36 = vcombine.high %v167_v31, %v175_v32  ;;  %v151_v39 = vld [vmem:[%s4003_s3 + $0xa8] sm:$0xff]  ;;  %v2522_v42 = vcombine.low %v167_v31, %v175_v32  ;;  %v185_v56 = vld [vmem:[%s4003_s3 + $0x1b8] sm:$0xff]  ;;  %v2541_v60 = vcombine.high %v184_v54, %v192_v55  ;;  %s48_s19 = sadd.s32 1, %s3122_s19  }
  0x36   : > { %v2537_v27 = vcombine.high %v182_v21, %v190_v22  ;;  %v166_v29 = vld [vmem:[%s4003_s3 + $0x120] sm:$0xff]  ;;  %v2536_v33 = vcombine.low %v182_v21, %v190_v22  ;;  %v159_v40 = vld [vmem:[%s4003_s3 + $0xe8] sm:$0xff]  ;;  %v193_v57 = vld [vmem:[%s4003_s3 + $0x1f8] sm:$0xff]  ;;  %p45_p10 = scmp.ge.s32.totalorder %s48_s19, 3  }
  0x37   : > { %v174_v30 = vld [vmem:[%s4003_s3 + $0x160] sm:$0xff]  ;;  %v135_v47 = vld [vmem:[%s4003_s3 + $0x28] sm:$0xff]  ;;  %v2506_v51 = vcombine.low %v151_v39, %v159_v40  ;;  %v2543_v61 = vcombine.high %v185_v56, %v193_v57  ;;  %v168_v62 = vld [vmem:[%s4003_s3 + $0x130] sm:$0xff]  ;;  %v2542_v5 = vcombine.low %v185_v56, %v193_v57 }
  0x38   : > { %v2521_v35 = vcombine.high %v166_v29, %v174_v30  ;;  %v150_v37 = vld [vmem:[%s4003_s3 + $0xa0] sm:$0xff]  ;;  %v2520_v41 = vcombine.low %v166_v29, %v174_v30  ;;  %v143_v49 = vld [vmem:[%s4003_s3 + $0x68] sm:$0xff]  ;;  %v176_v63 = vld [vmem:[%s4003_s3 + $0x170] sm:$0xff] }
  0x39   : > { %v158_v38 = vld [vmem:[%s4003_s3 + $0xe0] sm:$0xff]  ;;  %v2491_v53 = vcombine.high %v135_v47, %v143_v49  ;;  %v2525_v6 = vcombine.high %v168_v62, %v176_v63  ;;  %v152_v8 = vld [vmem:[%s4003_s3 + $0xb0] sm:$0xff]  ;;  %v2928_v32 = vld [vmem:[%s4004_s4 + $0x68] sm:$0xff]  }
  0x3a   : > { %v2505_v43 = vcombine.high %v150_v37, %v158_v38  ;;  %v142_v46 = vld [vmem:[%s4003_s3 + $0x60] sm:$0xff]  ;;  %v2504_v50 = vcombine.low %v150_v37, %v158_v38  ;;  %v136_v16 = vld [vmem:[%s4003_s3 + $0x30] sm:$0xff]  ;;  %v2921_v37 = vld [vmem:[%s4004_s4 + $0xf8] sm:$0xff]  }
  0x3b   : > { %v122_v59 = vld [vmem:[#allocation3] sm:$0xff]  ;;  %v2924_v29 = vld [vmem:[%s4004_s4 + $0x70] sm:$0xff]   ;;  %v2939_v56 = vld [vmem:[%s4004_s4 + $0x98] sm:$0xff]  }
  0x3c   : > { %v2917_v30 = vld [vmem:[%s4005_s5 + $0x10] sm:$0xff]   ;;  %v2934_v38 = vld [vmem:[%s4004_s4 + $0x20] sm:$0xff]  }
  0x3d   : > { %v2926_v31 = vld [vmem:[%s4004_s4 + $0x30] sm:$0xff]  }
  0x3e   : > { %v2941_v57 = vld [vmem:[%s4004_s4 + $0xd0] sm:$0xff]  }
  0xa6   : > { %v126_v0 = vpop.permute.xlu0 %125 }
  0xa7   : > { %v3391_v1 = vsel %vm41_vm0, %v122_v59, %v126_v0  ;;  %v2490_v59 = vcombine.low %v135_v47, %v143_v49  ;;  %v169_v0 = vld [vmem:[%s4003_s3 + $0x138] sm:$0xff]  ;;  %v2931_v47 = vld [vmem:[%s4004_s4 + $0xa8] sm:$0xff]   ;;  %v2933_v49 = vld [vmem:[%s4004_s4 + $0xe0] sm:$0xff]  }
  0xa8   : > { %v3395_v2 = vpack.c.bf16 %v3391_v1, %v3391_v1  ;;  %847 = vrot.lane.b32.xlu0 %v3391_v1, %s3128_s20 }
  0xaa   : > { %2544 = vmatmul.mubr.msk.bf16.vlgmr.msra.gmra.mxu0 %vm514_vm2, %v3395_v2  ;;  %2545 = vmatmul.mubr.msk.bf16.vlgmr.msra.gmra.mxu1 %vm514_vm2, %v3395_v2 }
  0xab   : > { %609 = vmatpush1.bf16.msra.mxu0 %v2532_v44  ;;  %650 = vmatpush1.bf16.msra.mxu1 %v2534_v45  ;;  %v2507_v44 = vcombine.high %v151_v39, %v159_v40  ;;  %v134_v45 = vld [vmem:[%s4003_s3 + $0x20] sm:$0xff]  ;;  %v2936_v39 = vld [vmem:[%s4004_s4 + $0x58] sm:$0xff]  }
  0xac   : > { %610 = vmatprep.subr.bf16.mxu0 %v2517_v3  ;;  %651 = vmatprep.subr.bf16.mxu1 %v2519_v4  ;;  %v2489_v52 = vcombine.high %v134_v45, %v142_v46  ;;  %v2488_v58 = vcombine.low %v134_v45, %v142_v46  ;;  %v177_v3 = vld [vmem:[%s4003_s3 + $0x178] sm:$0xff]  ;;  %v2540_v4 = vcombine.low %v184_v54, %v192_v55  ;;  %v2929_v45 = vld [vmem:[%s4004_s4 + $0xe8] sm:$0xff]   ;;  %v2942_v46 = vld [vmem:[%s4004_s4 + $0x10] sm:$0xff]  }
  0xad   : > { %632 = vmatprep.mubr.bf16.mxu0 %v3126_v48  ;;  %673 = vmatprep.mubr.bf16.mxu1 %v3126_v48  ;;  %v2527_v7 = vcombine.high %v169_v0, %v177_v3  ;;  %v2526_v13 = vcombine.low %v169_v0, %v177_v3  ;;  %v2923_v40 = vld [vmem:[%s4004_s4 + $0xb8] sm:$0xff]   ;;  %v2950_v54 = vld [vmem:[%s4004_s4] sm:$0xff]  }
  0xae   : > { %v2952_v55 = vld [vmem:[%s4004_s4 + $0x178] sm:$0xff]  }
  0xaf   : > { %611 = vmatpush1.bf16.msra.mxu0 %v2516_v9  ;;  %652 = vmatpush1.bf16.msra.mxu1 %v2518_v10  ;;  %v160_v9 = vld [vmem:[%s4003_s3 + $0xf0] sm:$0xff]  ;;  %v153_v10 = vld [vmem:[%s4003_s3 + $0xb8] sm:$0xff] }
  0xb0   : > { %612 = vmatprep.subr.bf16.mxu0 %v2501_v11  ;;  %653 = vmatprep.subr.bf16.mxu1 %v2503_v12  ;;  %v161_v11 = vld [vmem:[%s4003_s3 + $0xf8] sm:$0xff]  ;;  %v2524_v12 = vcombine.low %v168_v62, %v176_v63  ;;  %v2509_v14 = vcombine.high %v152_v8, %v160_v9  ;;  %v2951_v62 = vld [vmem:[%s4004_s4 + $0x80] sm:$0xff]  }
  0xb1   : > { %v2511_v15 = vcombine.high %v153_v10, %v161_v11  ;;  %v2510_v21 = vcombine.low %v153_v10, %v161_v11  ;;  %v2953_v63 = vld [vmem:[%s4004_s4 + $0x1f8] sm:$0xff]  }
  0xb3   : > { %613 = vmatpush1.bf16.msra.mxu0 %v2500_v17  ;;  %654 = vmatpush1.bf16.msra.mxu1 %v2502_v18  ;;  %v144_v17 = vld [vmem:[%s4003_s3 + $0x70] sm:$0xff]  ;;  %v137_v18 = vld [vmem:[%s4003_s3 + $0x38] sm:$0xff] }
  0xb4   : > { %614 = vmatprep.subr.bf16.mxu0 %v2485_v19  ;;  %655 = vmatprep.subr.bf16.mxu1 %v2487_v20  ;;  %v145_v19 = vld [vmem:[%s4003_s3 + $0x78] sm:$0xff]  ;;  %v2508_v20 = vcombine.low %v152_v8, %v160_v9  ;;  %v2493_v22 = vcombine.high %v136_v16, %v144_v17  ;;  %v2492_v24 = vcombine.low %v136_v16, %v144_v17 }
  0xb5   : > { %v2495_v23 = vcombine.high %v137_v18, %v145_v19  ;;  %v2954_v16 = vld [vmem:[%s4004_s4 + $0x138] sm:$0xff]  }
  0xb7   : > { %615 = vmatpush1.bf16.msra.mxu0 %v2484_v25  ;;  %656 = vmatpush1.bf16.msra.mxu1 %v2486_v26  ;;  %v2494_v25 = vcombine.low %v137_v18, %v145_v19  ;;  %v2920_v26 = vld [vmem:[%s4004_s4 + $0x78] sm:$0xff]  }
  0xb8   : > { %690 = vmatprep.subr.bf16.mxu0 %v2537_v27  ;;  %731 = vmatprep.subr.bf16.mxu1 %v2539_v28  ;;  %v3129_v27 = vmov 0.0   ;;  %v2922_v28 = vld [vmem:[%s4004_s4 + $0x38] sm:$0xff]  }
  0xba   : > { %2546 = vmatmul.mubr.msk.bf16.vlgmr.msra.gmra.mxu0 %vm514_vm2, %v3395_v2  ;;  %2547 = vmatmul.mubr.msk.bf16.vlgmr.msra.gmra.mxu1 %vm514_vm2, %v3395_v2 }
  0xbb   : > { %691 = vmatpush1.bf16.msra.mxu0 %v2536_v33  ;;  %732 = vmatpush1.bf16.msra.mxu1 %v2538_v34  ;;  %v2918_v33 = vld [vmem:[%s4005_s5 + $0x8] sm:$0xff]  }
  0xbc   : > { %692 = vmatprep.subr.bf16.mxu0 %v2521_v35  ;;  %733 = vmatprep.subr.bf16.mxu1 %v2523_v36  ;;  %v2930_v34 = vld [vmem:[%s4004_s4 + $0x28] sm:$0xff]   ;;  %v2932_v35 = vld [vmem:[%s4004_s4 + $0x60] sm:$0xff]  }
  0xbd   : > { %714 = vmatprep.mubr.bf16.mxu0 %v3126_v48  ;;  %755 = vmatprep.mubr.bf16.mxu1 %v3126_v48  ;;  %v2919_v36 = vld [vmem:[%s4005_s5] sm:$0xff]  }
  0xbf   : > { %693 = vmatpush1.bf16.msra.mxu0 %v2520_v41  ;;  %734 = vmatpush1.bf16.msra.mxu1 %v2522_v42  ;;  %v2925_v41 = vld [vmem:[%s4004_s4 + $0xf0] sm:$0xff]   ;;  %v2938_v42 = vld [vmem:[%s4004_s4 + $0x18] sm:$0xff]  }
  0xc0   : > { %694 = vmatprep.subr.bf16.mxu0 %v2505_v43  ;;  %735 = vmatprep.subr.bf16.mxu1 %v2507_v44  ;;  %v2940_v43 = vld [vmem:[%s4004_s4 + $0x50] sm:$0xff]  }
  0xc1   : > { %v2927_v44 = vld [vmem:[%s4004_s4 + $0xb0] sm:$0xff]  }
  0xc3   : > { %695 = vmatpush1.bf16.msra.mxu0 %v2504_v50  ;;  %736 = vmatpush1.bf16.msra.mxu1 %v2506_v51  ;;  %v2946_v50 = vld [vmem:[%s4004_s4 + $0x8] sm:$0xff]   ;;  %v2948_v51 = vld [vmem:[%s4004_s4 + $0x40] sm:$0xff]  }
  0xc4   : > { %696 = vmatprep.subr.bf16.mxu0 %v2489_v52  ;;  %737 = vmatprep.subr.bf16.mxu1 %v2491_v53  ;;  %v2935_v52 = vld [vmem:[%s4004_s4 + $0xa0] sm:$0xff]   ;;  %v2937_v53 = vld [vmem:[%s4004_s4 + $0xd8] sm:$0xff]  }
  0xc7   : > { %697 = vmatpush1.bf16.msra.mxu0 %v2488_v58  ;;  %738 = vmatpush1.bf16.msra.mxu1 %v2490_v59  ;;  %v2943_v58 = vld [vmem:[%s4004_s4 + $0x90] sm:$0xff]   ;;  %v2945_v59 = vld [vmem:[%s4004_s4 + $0xc8] sm:$0xff]  }
  0xc8   : > { %772 = vmatprep.subr.bf16.mxu0 %v2541_v60  ;;  %813 = vmatprep.subr.bf16.mxu1 %v2543_v61  ;;  %v2947_v60 = vld [vmem:[%s4004_s4 + $0x88] sm:$0xff]   ;;  %v2949_v61 = vld [vmem:[%s4004_s4 + $0xc0] sm:$0xff]  }
  0xca   : > { %2548 = vmatmul.mubr.msk.bf16.vlgmr.msra.gmra.mxu0 %vm514_vm2, %v3395_v2  ;;  %2549 = vmatmul.mubr.msk.bf16.vlgmr.msra.gmra.mxu1 %vm514_vm2, %v3395_v2 }
  0xcb   : > { %773 = vmatpush1.bf16.msra.mxu0 %v2540_v4  ;;  %814 = vmatpush1.bf16.msra.mxu1 %v2542_v5 }
  0xcc   : > { %774 = vmatprep.subr.bf16.mxu0 %v2525_v6  ;;  %815 = vmatprep.subr.bf16.mxu1 %v2527_v7 }
  0xcd   : > { %796 = vmatprep.mubr.bf16.mxu0 %v3126_v48  ;;  %837 = vmatprep.mubr.bf16.mxu1 %v3126_v48  ;;  %v2916_v48 = vld [vmem:[%s4005_s5 + $0x18] sm:$0xff]   ;;  %s3131_s5 = smov (%p45_p10), [#allocation8]  }
  0xcf   : > { %775 = vmatpush1.bf16.msra.mxu0 %v2524_v12  ;;  %816 = vmatpush1.bf16.msra.mxu1 %v2526_v13 }
  0xd0   : > { %776 = vmatprep.subr.bf16.mxu0 %v2509_v14  ;;  %817 = vmatprep.subr.bf16.mxu1 %v2511_v15 }
  0xd3   : > { %777 = vmatpush1.bf16.msra.mxu0 %v2508_v20  ;;  %818 = vmatpush1.bf16.msra.mxu1 %v2510_v21  ;;  %v2956_v21 = vld [vmem:[%s4004_s4 + $0x170] sm:$0xff]  }
  0xd4   : > { %778 = vmatprep.subr.bf16.mxu0 %v2493_v22  ;;  %819 = vmatprep.subr.bf16.mxu1 %v2495_v23  ;;  %v2957_v22 = vld [vmem:[%s4004_s4 + $0x1f0] sm:$0xff]  }
  0xd5   : > { %v2958_v23 = vld [vmem:[%s4004_s4 + $0x130] sm:$0xff]  }
  0xd7   : > { %779 = vmatpush1.bf16.msra.mxu0 %v2492_v24  ;;  %820 = vmatpush1.bf16.msra.mxu1 %v2494_v25  ;;  %v2959_v24 = vld [vmem:[%s4004_s4 + $0x1b0] sm:$0xff]   ;;  %v2960_v25 = vld [vmem:[%s4004_s4 + $0x168] sm:$0xff]  }
  0xd8   : > { %2878 = vmatprep.subr.bf16.mxu0 %v3129_v27  ;;  %2698 = vmatprep.subr.bf16.mxu1 %v2920_v26  ;;  %v2961_v26 = vld [vmem:[%s4004_s4 + $0x1e8] sm:$0xff]  }
  0xda   : > { %2550 = vmatmul.mubr.msk.bf16.vlgmr.msra.gmra.mxu0 %vm514_vm2, %v3395_v2  ;;  %2551 = vmatmul.mubr.msk.bf16.vlgmr.msra.gmra.mxu1 %vm514_vm2, %v3395_v2 }
  0xdb   : > { %2879 = vmatpush3.bf16.msra.mxu0 %v2916_v48  ;;  %2886 = vmatprep.mubr.msk.bf16.mxu0 %vm3130_vm3, %v3129_v27  ;;  %v2962_v48 = vld [vmem:[%s4004_s4 + $0x128] sm:$0xff]  }
  0xdc   : > { %2880 = vmatprep.subr.bf16.mxu0 %v3129_v27  ;;  %2699 = vmatpush3.bf16.msra.mxu1 %v2922_v28  ;;  %v2964_v28 = vld [vmem:[%s4004_s4 + $0x160] sm:$0xff]  }
  0xdd   : > { %2700 = vmatprep.subr.bf16.mxu1 %v2924_v29  ;;  %v2965_v29 = vld [vmem:[%s4004_s4 + $0x1e0] sm:$0xff]  }
  0xdf   : > { %2881 = vmatpush3.bf16.msra.mxu0 %v2917_v30 }
  0xe0   : > { %2882 = vmatprep.subr.bf16.mxu0 %v3129_v27  ;;  %2701 = vmatpush3.bf16.msra.mxu1 %v2926_v31 }
  0xe1   : > { %2702 = vmatprep.subr.bf16.mxu1 %v2928_v32  ;;  %v2966_v32 = vld [vmem:[%s4004_s4 + $0x120] sm:$0xff]  }
  0xe3   : > { %2883 = vmatpush3.bf16.msra.mxu0 %v2918_v33  ;;  %v2967_v33 = vld [vmem:[%s4004_s4 + $0x1a0] sm:$0xff]  }
  0xe4   : > { %2884 = vmatprep.subr.bf16.mxu0 %v3129_v27  ;;  %2703 = vmatpush3.bf16.msra.mxu1 %v2930_v34  ;;  %v2963_v27 = vld [vmem:[%s4004_s4 + $0x1a8] sm:$0xff]  }
  0xe5   : > { %2704 = vmatprep.subr.bf16.mxu1 %v2932_v35 }
  0xe7   : > { %2885 = vmatpush3.bf16.msra.mxu0 %v2919_v36  ;;  %v2968_v36 = vld [vmem:[%s4004_s4 + $0x158] sm:$0xff]  }
  0xe8   : > { %2720 = vmatprep.subr.bf16.mxu0 %v2921_v37  ;;  %2705 = vmatpush3.bf16.msra.mxu1 %v2934_v38  ;;  %v2969_v37 = vld [vmem:[%s4004_s4 + $0x1d8] sm:$0xff]  }
  0xe9   : > { %2706 = vmatprep.subr.bf16.mxu1 %v2936_v39 }
  0xea   : > { %2887 = vmatmul.mubr.msk.bf16.vlgmr.msra.gmra.mxu0 %vm514_vm2, %v3395_v2  ;;  %v2944_v2 = vld [vmem:[%s4004_s4 + $0x48] sm:$0xff]  }
  0xeb   : > { %2721 = vmatpush3.bf16.msra.mxu0 %v2923_v40 }
  0xec   : > { %2722 = vmatprep.subr.bf16.mxu0 %v2925_v41  ;;  %2707 = vmatpush3.bf16.msra.mxu1 %v2938_v42 }
  0xed   : > { %2708 = vmatprep.subr.bf16.mxu1 %v2940_v43 }
  0xef   : > { %2723 = vmatpush3.bf16.msra.mxu0 %v2927_v44  ;;  %v2970_v44 = vld [vmem:[%s4004_s4 + $0x118] sm:$0xff]  }
  0xf0   : > { %2724 = vmatprep.subr.bf16.mxu0 %v2929_v45  ;;  %2709 = vmatpush3.bf16.msra.mxu1 %v2942_v46  ;;  %v2971_v45 = vld [vmem:[%s4004_s4 + $0x198] sm:$0xff]  }
  0xf1   : > { %2710 = vmatprep.subr.bf16.mxu1 %v2944_v2 }
  0xf3   : > { %2725 = vmatpush3.bf16.msra.mxu0 %v2931_v47  ;;  %v2972_v47 = vld [vmem:[%s4004_s4 + $0x150] sm:$0xff]  }
  0xf4   : > { %2726 = vmatprep.subr.bf16.mxu0 %v2933_v49  ;;  %2711 = vmatpush3.bf16.msra.mxu1 %v2946_v50  ;;  %v2973_v49 = vld [vmem:[%s4004_s4 + $0x1d0] sm:$0xff]  }
  0xf5   : > { %2712 = vmatprep.subr.bf16.mxu1 %v2948_v51  ;;  %v2974_v50 = vld [vmem:[%s4004_s4 + $0x110] sm:$0xff]  }
  0xf6   : > { %v2975_v51 = vld [vmem:[%s4004_s4 + $0x190] sm:$0xff]  }
  0xf7   : > { %2727 = vmatpush3.bf16.msra.mxu0 %v2935_v52  ;;  %v2976_v52 = vld [vmem:[%s4004_s4 + $0x148] sm:$0xff]  }
  0xf8   : > { %2728 = vmatprep.subr.bf16.mxu0 %v2937_v53  ;;  %2713 = vmatpush3.bf16.msra.mxu1 %v2950_v54  ;;  %v2977_v53 = vld [vmem:[%s4004_s4 + $0x1c8] sm:$0xff]  }
  0xf9   : > { %2742 = vmatprep.subr.bf16.mxu1 %v2952_v55  ;;  %v2978_v54 = vld [vmem:[%s4004_s4 + $0x108] sm:$0xff]  }
  0xfa   : > { %v2979_v55 = vld [vmem:[%s4004_s4 + $0x188] sm:$0xff]  }
  0xfb   : > { %2729 = vmatpush3.bf16.msra.mxu0 %v2939_v56  ;;  %v2980_v56 = vld [vmem:[%s4004_s4 + $0x140] sm:$0xff]  }
  0xfc   : > { %2730 = vmatprep.subr.bf16.mxu0 %v2941_v57  ;;  %v2981_v57 = vld [vmem:[%s4004_s4 + $0x1c0] sm:$0xff]  }
  0xff   : > { %2731 = vmatpush3.bf16.msra.mxu0 %v2943_v58 }
 0x100   : > { %2732 = vmatprep.subr.bf16.mxu0 %v2945_v59 }
 0x103   : > { %2733 = vmatpush3.bf16.msra.mxu0 %v2947_v60  ;;  %v2982_v60 = vld [vmem:[%s4004_s4 + $0x100] sm:$0xff]  }
 0x104   : > { %2734 = vmatprep.subr.bf16.mxu0 %v2949_v61  ;;  %v2983_v61 = vld [vmem:[%s4004_s4 + $0x180] sm:$0xff]  }
 0x107   : > { %2735 = vmatpush3.bf16.msra.mxu0 %v2951_v62 }
 0x108   : > { %2764 = vmatprep.subr.bf16.mxu0 %v2953_v63 }
 0x11a   : > { %v848_v0 = vpop.permute.xlu0 %847 }
 0x11b   : > { %v3664_v5 = vsel %vm514_vm2, %v3391_v1, %v848_v0  ;;  %v2955_v1 = vld [vmem:[%s4004_s4 + $0x1b8] sm:$0xff]  }
 0x16a   : > { %v552_v3 = vpop.f32.mrf.mxu0  ;;  %v593_v4 = vpop.f32.mrf.mxu1 }
 0x16b   : > { %v851_v6 = vmul.f32 %v3664_v5, %v552_v3  ;;  %v853_v7 = vmul.f32 %v3664_v5, %v593_v4  ;;  %v2984_v4 = vld [vmem:[%s4004_s4 + $0x278] sm:$0xff]  }
 0x16c   : > { %v554_v8 = vpop.f32.mrf.mxu0  ;;  %v595_v9 = vpop.f32.mrf.mxu1 }
 0x16d   : > { %v852_v10 = vmul.f32 %v3664_v5, %v554_v8  ;;  %v854_v11 = vmul.f32 %v3664_v5, %v595_v9  ;;  %v867_v17 = vpack.c.bf16 %v851_v6, %v851_v6  ;;  %v869_v18 = vpack.c.bf16 %v853_v7, %v853_v7  ;;  %v2985_v6 = vld [vmem:[%s4004_s4 + $0x2f8] sm:$0xff]  }
 0x16e   : > { %v556_v12 = vpop.f32.mrf.mxu0  ;;  %v597_v13 = vpop.f32.mrf.mxu1 }
 0x16f   : > { %v868_v14 = vpack.c.bf16 %v852_v10, %v852_v10  ;;  %v870_v15 = vpack.c.bf16 %v854_v11, %v854_v11  ;;  %v2986_v11 = vld [vmem:[%s4004_s4 + $0x238] sm:$0xff]  }
 0x170   : > { %v557_v19 = vpop.f32.mrf.mxu0  ;;  %v598_v20 = vpop.f32.mrf.mxu1 }
 0x171   : > { %2011 = vmatprep.mubr.bf16.mxu1 %v868_v14  ;;  %2051 = vmatprep.mubr.bf16.mxu0 %v870_v15  ;;  %v2990_v20 = vld [vmem:[%s4004_s4 + $0x230] sm:$0xff]  }
 0x172   : > { %2012 = vmatmul.mubr.bf16.vlgmr.msra.gmra.mxu1 %v867_v17  ;;  %2052 = vmatmul.mubr.bf16.vlgmr.msra.gmra.mxu0 %v869_v18  ;;  %v2988_v17 = vld [vmem:[%s4004_s4 + $0x270] sm:$0xff]  }
 0x173   : > { %2743 = vmatpush3.bf16.msra.mxu1 %v2954_v16  ;;  %2765 = vmatpush3.bf16.msra.mxu0 %v2955_v1  ;;  %v2987_v16 = vld [vmem:[%s4004_s4 + $0x2b8] sm:$0xff]   ;;  %v2989_v18 = vld [vmem:[%s4004_s4 + $0x2f0] sm:$0xff]  }
 0x174   : > { %2744 = vmatprep.subr.bf16.mxu1 %v2956_v21  ;;  %2766 = vmatprep.subr.bf16.mxu0 %v2957_v22  ;;  %v2991_v21 = vld [vmem:[%s4004_s4 + $0x2b0] sm:$0xff]   ;;  %v2992_v22 = vld [vmem:[%s4004_s4 + $0x268] sm:$0xff]  }
 0x177   : > { %2745 = vmatpush3.bf16.msra.mxu1 %v2958_v23  ;;  %2767 = vmatpush3.bf16.msra.mxu0 %v2959_v24  ;;  %v2993_v23 = vld [vmem:[%s4004_s4 + $0x2e8] sm:$0xff]  }
 0x178   : > { %2746 = vmatprep.subr.bf16.mxu1 %v2960_v25  ;;  %2768 = vmatprep.subr.bf16.mxu0 %v2961_v26  ;;  %v2994_v24 = vld [vmem:[%s4004_s4 + $0x228] sm:$0xff]   ;;  %v2996_v26 = vld [vmem:[%s4004_s4 + $0x260] sm:$0xff]  }
 0x179   : > { %v2995_v25 = vld [vmem:[%s4004_s4 + $0x2a8] sm:$0xff]  }
 0x17a   : > { %v634_v30 = vpop.f32.mrf.mxu0  ;;  %v675_v31 = vpop.f32.mrf.mxu1 }
 0x17b   : > { %2747 = vmatpush3.bf16.msra.mxu1 %v2962_v48  ;;  %2769 = vmatpush3.bf16.msra.mxu0 %v2963_v27  ;;  %v855_v62 = vmul.f32 %v3664_v5, %v634_v30  ;;  %v857_v63 = vmul.f32 %v3664_v5, %v675_v31  ;;  %v2997_v48 = vld [vmem:[%s4004_s4 + $0x2e0] sm:$0xff]  }
 0x17c   : > { %v636_v34 = vpop.f32.mrf.mxu0  ;;  %v677_v35 = vpop.f32.mrf.mxu1  ;;  %2748 = vmatprep.subr.bf16.mxu1 %v2964_v28  ;;  %2770 = vmatprep.subr.bf16.mxu0 %v2965_v29  ;;  %v2998_v29 = vld [vmem:[%s4004_s4 + $0x220] sm:$0xff]  }
 0x17d   : > { %v856_v38 = vmul.f32 %v3664_v5, %v636_v34  ;;  %v858_v39 = vmul.f32 %v3664_v5, %v677_v35  ;;  %v871_v12 = vpack.c.bf16 %v855_v62, %v855_v62  ;;  %v873_v13 = vpack.c.bf16 %v857_v63, %v857_v63  ;;  %v3001_v34 = vld [vmem:[%s4004_s4 + $0x2d8] sm:$0xff]  }
 0x17e   : > { %v638_v40 = vpop.f32.mrf.mxu0  ;;  %v679_v41 = vpop.f32.mrf.mxu1  ;;  %v3018_v63 = vld [vmem:[%s4004_s4 + $0x338] sm:$0xff]  }
 0x17f   : > { %v872_v42 = vpack.c.bf16 %v856_v38, %v856_v38  ;;  %v874_v43 = vpack.c.bf16 %v858_v39, %v858_v39  ;;  %2749 = vmatpush3.bf16.msra.mxu1 %v2966_v32  ;;  %2771 = vmatpush3.bf16.msra.mxu0 %v2967_v33  ;;  %v2999_v32 = vld [vmem:[%s4004_s4 + $0x2a0] sm:$0xff]   ;;  %v3000_v33 = vld [vmem:[%s4004_s4 + $0x258] sm:$0xff]   ;;  %v3004_v41 = vld [vmem:[%s4004_s4 + $0x250] sm:$0xff]  }
 0x180   : > { %v639_v46 = vpop.f32.mrf.mxu0  ;;  %v680_v2 = vpop.f32.mrf.mxu1  ;;  %2750 = vmatprep.subr.bf16.mxu1 %v2968_v36  ;;  %2772 = vmatprep.subr.bf16.mxu0 %v2969_v37  ;;  %v3002_v37 = vld [vmem:[%s4004_s4 + $0x218] sm:$0xff]  }
 0x181   : > { %2091 = vmatprep.mubr.bf16.mxu1 %v872_v42  ;;  %2131 = vmatprep.mubr.bf16.mxu0 %v874_v43  ;;  %v3003_v40 = vld [vmem:[%s4004_s4 + $0x298] sm:$0xff]   ;;  %v3005_v42 = vld [vmem:[%s4004_s4 + $0x2d0] sm:$0xff]   ;;  %v3009_v46 = vld [vmem:[%s4004_s4 + $0x2c8] sm:$0xff]  }
 0x182   : > { %v3006_v43 = vld [vmem:[%s4004_s4 + $0x210] sm:$0xff]   ;;  %v3010_v2 = vld [vmem:[%s4004_s4 + $0x208] sm:$0xff]  }
 0x183   : > { %2751 = vmatpush3.bf16.msra.mxu1 %v2970_v44  ;;  %2773 = vmatpush3.bf16.msra.mxu0 %v2971_v45  ;;  %v3007_v44 = vld [vmem:[%s4004_s4 + $0x290] sm:$0xff]   ;;  %v3008_v45 = vld [vmem:[%s4004_s4 + $0x248] sm:$0xff]  }
 0x184   : > { %2752 = vmatprep.subr.bf16.mxu1 %v2972_v47  ;;  %2774 = vmatprep.subr.bf16.mxu0 %v2973_v49  ;;  %v3011_v47 = vld [vmem:[%s4004_s4 + $0x288] sm:$0xff]   ;;  %v3012_v49 = vld [vmem:[%s4004_s4 + $0x240] sm:$0xff]  }
 0x187   : > { %2753 = vmatpush3.bf16.msra.mxu1 %v2974_v50  ;;  %2775 = vmatpush3.bf16.msra.mxu0 %v2975_v51  ;;  %v3013_v50 = vld [vmem:[%s4004_s4 + $0x2c0] sm:$0xff]  }
 0x188   : > { %2754 = vmatprep.subr.bf16.mxu1 %v2976_v52  ;;  %2776 = vmatprep.subr.bf16.mxu0 %v2977_v53  ;;  %v3014_v52 = vld [vmem:[%s4004_s4 + $0x200] sm:$0xff]  }
 0x18a   : > { %v3756_v58 = vpop.f32.mrf.mxu0  ;;  %v3758_v59 = vpop.f32.mrf.mxu1 }
 0x18b   : > { %2755 = vmatpush3.bf16.msra.mxu1 %v2978_v54  ;;  %2777 = vmatpush3.bf16.msra.mxu0 %v2979_v55  ;;  %v859_v53 = vmul.f32 %v3664_v5, %v3756_v58  ;;  %v3015_v55 = vld [vmem:[%s4004_s4 + $0x280] sm:$0xff]  }
 0x18c   : > { %v718_v0 = vpop.f32.mrf.mxu0  ;;  %v759_v3 = vpop.f32.mrf.mxu1  ;;  %2756 = vmatprep.subr.bf16.mxu1 %v2980_v56  ;;  %2778 = vmatprep.subr.bf16.mxu0 %v2981_v57  ;;  %v3016_v56 = vld [vmem:[%s4004_s4 + $0x378] sm:$0xff]   ;;  %v861_v57 = vmul.f32 %v3664_v5, %v3758_v59 }
 0x18d   : > { %v860_v7 = vmul.f32 %v3664_v5, %v718_v0  ;;  %v862_v8 = vmul.f32 %v3664_v5, %v759_v3  ;;  %v875_v0 = vpack.c.bf16 %v859_v53, %v859_v53  ;;  %v3019_v59 = vld [vmem:[%s4004_s4 + $0x3b8] sm:$0xff]  }
 0x18e   : > { %v720_v9 = vpop.f32.mrf.mxu0  ;;  %v761_v10 = vpop.f32.mrf.mxu1 }
 0x18f   : > { %2757 = vmatpush3.bf16.msra.mxu1 %v2982_v60  ;;  %2779 = vmatpush3.bf16.msra.mxu0 %v2983_v61  ;;  %v876_v1 = vpack.c.bf16 %v860_v7, %v860_v7  ;;  %v878_v19 = vpack.c.bf16 %v862_v8, %v862_v8  ;;  %v3017_v60 = vld [vmem:[%s4004_s4 + $0x3f8] sm:$0xff]   ;;  %v3021_v8 = vld [vmem:[%s4004_s4 + $0x3f0] sm:$0xff]  }
 0x190   : > { %v721_v14 = vpop.f32.mrf.mxu0  ;;  %v762_v15 = vpop.f32.mrf.mxu1  ;;  %2786 = vmatprep.subr.bf16.mxu1 %v2984_v4  ;;  %2808 = vmatprep.subr.bf16.mxu0 %v2985_v6  ;;  %v877_v4 = vpack.c.bf16 %v861_v57, %v861_v57  ;;  %v3020_v6 = vld [vmem:[%s4004_s4 + $0x370] sm:$0xff]  }
 0x191   : > { %v3022_v10 = vld [vmem:[%s4004_s4 + $0x330] sm:$0xff]   ;;  %v3026_v14 = vld [vmem:[%s4004_s4 + $0x328] sm:$0xff]  }
 0x192   : > { %2092 = vmatmul.mubr.bf16.vlgmr.msra.gmra.mxu1 %v871_v12  ;;  %2132 = vmatmul.mubr.bf16.vlgmr.msra.gmra.mxu0 %v873_v13  ;;  %v3024_v12 = vld [vmem:[%s4004_s4 + $0x368] sm:$0xff]  }
 0x193   : > { %2787 = vmatpush3.bf16.msra.mxu1 %v2986_v11  ;;  %2171 = vmatprep.mubr.bf16.mxu1 %v876_v1  ;;  %v3023_v11 = vld [vmem:[%s4004_s4 + $0x3b0] sm:$0xff]   ;;  %v3025_v13 = vld [vmem:[%s4004_s4 + $0x3e8] sm:$0xff]   ;;  %v3029_v1 = vld [vmem:[%s4004_s4 + $0x3e0] sm:$0xff]  }
 0x194   : > { %2809 = vmatpush3.bf16.msra.mxu0 %v2987_v16  ;;  %2211 = vmatprep.mubr.bf16.mxu0 %v878_v19  ;;  %v3027_v15 = vld [vmem:[%s4004_s4 + $0x3a8] sm:$0xff]   ;;  %v3028_v16 = vld [vmem:[%s4004_s4 + $0x360] sm:$0xff]   ;;  %v3032_v19 = vld [vmem:[%s4004_s4 + $0x358] sm:$0xff]  }
 0x195   : > { %2788 = vmatprep.subr.bf16.mxu1 %v2988_v17  ;;  %2810 = vmatprep.subr.bf16.mxu0 %v2989_v18  ;;  %v3030_v17 = vld [vmem:[%s4004_s4 + $0x320] sm:$0xff]  }
 0x196   : > { %v3031_v18 = vld [vmem:[%s4004_s4 + $0x3a0] sm:$0xff]  }
 0x197   : > { %2789 = vmatpush3.bf16.msra.mxu1 %v2990_v20  ;;  %v3033_v20 = vld [vmem:[%s4004_s4 + $0x3d8] sm:$0xff]  }
 0x198   : > { %2811 = vmatpush3.bf16.msra.mxu0 %v2991_v21  ;;  %2790 = vmatprep.subr.bf16.mxu1 %v2992_v22  ;;  %v3034_v21 = vld [vmem:[%s4004_s4 + $0x318] sm:$0xff]  }
 0x199   : > { %2812 = vmatprep.subr.bf16.mxu0 %v2993_v23  ;;  %v3035_v22 = vld [vmem:[%s4004_s4 + $0x398] sm:$0xff]   ;;  %v3036_v23 = vld [vmem:[%s4004_s4 + $0x350] sm:$0xff]  }
 0x19a   : > { %v3812_v27 = vpop.f32.mrf.mxu0  ;;  %v3814_v28 = vpop.f32.mrf.mxu1 }
 0x19b   : > { %2791 = vmatpush3.bf16.msra.mxu1 %v2994_v24  ;;  %v3037_v24 = vld [vmem:[%s4004_s4 + $0x3d0] sm:$0xff]  }
 0x19c   : > { %2813 = vmatpush3.bf16.msra.mxu0 %v2995_v25  ;;  %v800_v30 = vpop.f32.mrf.mxu0  ;;  %v841_v31 = vpop.f32.mrf.mxu1  ;;  %2792 = vmatprep.subr.bf16.mxu1 %v2996_v26  ;;  %v3038_v25 = vld [vmem:[%s4004_s4 + $0x310] sm:$0xff]  }
 0x19d   : > { %2814 = vmatprep.subr.bf16.mxu0 %v2997_v48  ;;  %v864_v58 = vmul.f32 %v3664_v5, %v800_v30  ;;  %v866_v62 = vmul.f32 %v3664_v5, %v841_v31  ;;  %v3039_v26 = vld [vmem:[%s4004_s4 + $0x390] sm:$0xff]   ;;  %v3040_v48 = vld [vmem:[%s4004_s4 + $0x348] sm:$0xff]  }
 0x19e   : > { %v802_v35 = vpop.f32.mrf.mxu0  ;;  %v843_v36 = vpop.f32.mrf.mxu1  ;;  %v3042_v30 = vld [vmem:[%s4004_s4 + $0x308] sm:$0xff]  }
 0x19f   : > { %2793 = vmatpush3.bf16.msra.mxu1 %v2998_v29  ;;  %v880_v7 = vpack.c.bf16 %v864_v58, %v864_v58  ;;  %v882_v9 = vpack.c.bf16 %v866_v62, %v866_v62  ;;  %v3041_v29 = vld [vmem:[%s4004_s4 + $0x3c8] sm:$0xff]   ;;  %v863_v35 = vmul.f32 %v3664_v5, %v3812_v27  ;;  %v3047_v36 = vld [vmem:[%s4004_s4 + $0x380] sm:$0xff]  }
 0x1a0   : > { %2815 = vmatpush3.bf16.msra.mxu0 %v2999_v32  ;;  %v803_v38 = vpop.f32.mrf.mxu0  ;;  %v844_v39 = vpop.f32.mrf.mxu1  ;;  %2794 = vmatprep.subr.bf16.mxu1 %v3000_v33  ;;  %v3043_v31 = vld [vmem:[%s4004_s4 + $0x388] sm:$0xff]   ;;  %v3044_v32 = vld [vmem:[%s4004_s4 + $0x340] sm:$0xff]  }
 0x1a1   : > { %2816 = vmatprep.subr.bf16.mxu0 %v3001_v34  ;;  %v3045_v33 = vld [vmem:[%s4004_s4 + $0x3c0] sm:$0xff]   ;;  %v879_v38 = vpack.c.bf16 %v863_v35, %v863_v35 }
 0x1a2   : > { %v3046_v34 = vld [vmem:[%s4004_s4 + $0x300] sm:$0xff]  }
 0x1a3   : > { %2795 = vmatpush3.bf16.msra.mxu1 %v3002_v37  ;;  %v865_v37 = vmul.f32 %v3664_v5, %v3814_v28  ;;  %v2688_v35 = vld [vmem:[%s4008_s8] ss:$0 sm:$0xff] (%p45_p10) }
 0x1a4   : > { %2817 = vmatpush3.bf16.msra.mxu0 %v3003_v40  ;;  %2796 = vmatprep.subr.bf16.mxu1 %v3004_v41 }
 0x1a5   : > { %2818 = vmatprep.subr.bf16.mxu0 %v3005_v42  ;;  %v881_v39 = vpack.c.bf16 %v865_v37, %v865_v37 }
 0x1a7   : > { %2797 = vmatpush3.bf16.msra.mxu1 %v3006_v43 }
 0x1a8   : > { %2819 = vmatpush3.bf16.msra.mxu0 %v3007_v44  ;;  %2798 = vmatprep.subr.bf16.mxu1 %v3008_v45 }
 0x1a9   : > { %2820 = vmatprep.subr.bf16.mxu0 %v3009_v46 }
 0x1aa   : > { %v3864_v51 = vpop.f32.mrf.mxu0 }
 0x1ab   : > { %2799 = vmatpush3.bf16.msra.mxu1 %v3010_v2 }
 0x1ac   : > { %2821 = vmatpush3.bf16.msra.mxu0 %v3011_v47  ;;  %v2888_v54 = vpop.f32.mrf.mxu0  ;;  %2800 = vmatprep.subr.bf16.mxu1 %v3012_v49 }
 0x1ad   : > { %2822 = vmatprep.subr.bf16.mxu0 %v3013_v50 }
 0x1ae   : > { %v1208_v61 = vpop.f32.mrf.mxu0 }
 0x1af   : > { %2801 = vmatpush3.bf16.msra.mxu1 %v3014_v52 }
 0x1b0   : > { %2823 = vmatpush3.bf16.msra.mxu0 %v3015_v55  ;;  %v2889_v3 = vpop.f32.mrf.mxu0  ;;  %2830 = vmatprep.subr.bf16.mxu1 %v3016_v56 }
 0x1b1   : > { %2852 = vmatprep.subr.bf16.mxu0 %v3017_v60 }
 0x1b2   : > { %2172 = vmatmul.mubr.bf16.vlgmr.msra.gmra.mxu1 %v875_v0 }
 0x1b3   : > { %2212 = vmatmul.mubr.bf16.vlgmr.msra.gmra.mxu0 %v877_v4  ;;  %2831 = vmatpush3.bf16.msra.mxu1 %v3018_v63 }
 0x1b4   : > { %2251 = vmatprep.mubr.bf16.mxu1 %v880_v7  ;;  %2853 = vmatpush3.bf16.msra.mxu0 %v3019_v59 }
 0x1b5   : > { %2291 = vmatprep.mubr.bf16.mxu0 %v882_v9  ;;  %2832 = vmatprep.subr.bf16.mxu1 %v3020_v6 }
 0x1b6   : > { %2854 = vmatprep.subr.bf16.mxu0 %v3021_v8 }
 0x1b7   : > { %2833 = vmatpush3.bf16.msra.mxu1 %v3022_v10 }
 0x1b8   : > { %2855 = vmatpush3.bf16.msra.mxu0 %v3023_v11  ;;  %2834 = vmatprep.subr.bf16.mxu1 %v3024_v12 }
 0x1b9   : > { %2856 = vmatprep.subr.bf16.mxu0 %v3025_v13 }
 0x1bb   : > { %2835 = vmatpush3.bf16.msra.mxu1 %v3026_v14 }
 0x1bc   : > { %2857 = vmatpush3.bf16.msra.mxu0 %v3027_v15  ;;  %2836 = vmatprep.subr.bf16.mxu1 %v3028_v16 }
 0x1bd   : > { %2858 = vmatprep.subr.bf16.mxu0 %v3029_v1 }
 0x1bf   : > { %2837 = vmatpush3.bf16.msra.mxu1 %v3030_v17 }
 0x1c0   : > { %2859 = vmatpush3.bf16.msra.mxu0 %v3031_v18  ;;  %2838 = vmatprep.subr.bf16.mxu1 %v3032_v19 }
 0x1c1   : > { %2860 = vmatprep.subr.bf16.mxu0 %v3033_v20  ;;  %v2685_v20 = vld [vmem:[%s4006_s6] ss:$0 sm:$0xff]  ;;  %s2444_s6 = sshll.u32 (%p45_p10), %s3131_s5, 4  ;;  %s2445_s6 = int_to_ptr.vmem [resolvable:$true] %s2444_s6 }
 0x1c2   :  { %p3097_p12 = scmp.lt.s32.totalorder (%p45_p10), %s2445_s6, %s2445_s6 }
 0x1c3   : > { %2839 = vmatpush3.bf16.msra.mxu1 %v3034_v21 }
 0x1c4   : > { %2861 = vmatpush3.bf16.msra.mxu0 %v3035_v22  ;;  %2840 = vmatprep.subr.bf16.mxu1 %v3036_v23 }
 0x1c5   : > { %2862 = vmatprep.subr.bf16.mxu0 %v3037_v24 }
 0x1c7   : > { %2841 = vmatpush3.bf16.msra.mxu1 %v3038_v25 }
 0x1c8   : > { %2863 = vmatpush3.bf16.msra.mxu0 %v3039_v26  ;;  %2842 = vmatprep.subr.bf16.mxu1 %v3040_v48  ;;  %v3050_v26 = vld [vmem:[%s4007_s7 + $0x8] sm:$0xff] (%p45_p10)   ;;  %v3051_v48 = vld [vmem:[%s4007_s7] sm:$0xff] (%p45_p10)   ;;  %s3092_s7 = scalar_lea.vmem (%p45_p10), %s2445_s6, 512 }
 0x1c9   : > { %2864 = vmatprep.subr.bf16.mxu0 %v3041_v29  ;;  %p3093_p11 = scmp.ne.s32.totalorder (%p45_p10), %s2445_s6, %s3092_s7  ;;  %p3098_p13 = scmp.lt.s32.totalorder (%p45_p10), %s3092_s7, %s3092_s7 }
 0x1cb   : > { %2843 = vmatpush3.bf16.msra.mxu1 %v3042_v30  ;;  %p3099_p0 = por (%p45_p10), %p3098_p13, %p3097_p12 }
 0x1cc   : > { %2865 = vmatpush3.bf16.msra.mxu0 %v3043_v31  ;;  %2844 = vmatprep.subr.bf16.mxu1 %v3044_v32 }
 0x1cd   : > { %2866 = vmatprep.subr.bf16.mxu0 %v3045_v33  ;;  %p3100_p1 = pnand (%p45_p10), %p3099_p0, %p3093_p11 }
 0x1cf   : > { %2845 = vmatpush3.bf16.msra.mxu1 %v3046_v34 }
 0x1d0   : > { %2867 = vmatpush3.bf16.msra.mxu0 %v3047_v36 }
 0x1d1   :  { %2890 = vmatprep.subr.bf16.mxu0 (%p45_p10), %v3050_v26 }
 0x1d2   : > { %2252 = vmatmul.mubr.bf16.vlgmr.msra.gmra.mxu1 %v879_v38 }
 0x1d3   : > { %2292 = vmatmul.mubr.bf16.vlgmr.msra.gmra.mxu0 %v881_v39 }
 0x1d4   :  { %2891 = vmatpush3.bf16.msra.mxu0 (%p45_p10), %v3050_v26 }
 0x1d5   :  { %2892 = vmatprep.subr.bf16.mxu0 (%p45_p10), %v3051_v48 }
 0x1d8   :  { %2893 = vmatpush3.bf16.msra.mxu0 (%p45_p10), %v3051_v48 }
 0x232   : > { %v2714_v40 = vpop.f32.mrf.mxu1  ;;  %v2736_v41 = vpop.f32.mrf.mxu0 }
 0x234   : > { %v2715_v42 = vpop.f32.mrf.mxu1  ;;  %v2737_v27 = vpop.f32.mrf.mxu0 }
 0x235   : > { %v2716_v43 = vadd.f32 %v2715_v42, %v2714_v40  ;;  %v2738_v44 = vadd.f32 %v2737_v27, %v2736_v41 }
 0x236   : > { %v2717_v45 = vpop.f32.mrf.mxu1  ;;  %v2739_v46 = vpop.f32.mrf.mxu0 }
 0x237   : > { %v2014_v2 = vadd.f32 %v2716_v43, %v3864_v51 }
 0x238   : > { %v2718_v47 = vpop.f32.mrf.mxu1  ;;  %v2740_v49 = vpop.f32.mrf.mxu0 }
 0x239   : > { %v2054_v5 = vadd.f32 %v2738_v44, %v2014_v2 }
 0x252   : > { %v2758_v28 = vpop.f32.mrf.mxu1  ;;  %v2780_v50 = vpop.f32.mrf.mxu0 }
 0x254   : > { %v2759_v52 = vpop.f32.mrf.mxu1  ;;  %v2781_v53 = vpop.f32.mrf.mxu0 }
 0x255   : > { %v2760_v51 = vadd.f32 %v2759_v52, %v2758_v28  ;;  %v2782_v6 = vadd.f32 %v2781_v53, %v2780_v50 }
 0x256   : > { %v2761_v54 = vpop.f32.mrf.mxu1  ;;  %v2783_v55 = vpop.f32.mrf.mxu0 }
 0x257   : > { %v2094_v4 = vadd.f32 %v2760_v51, %v2054_v5 }
 0x258   : > { %v2762_v56 = vpop.f32.mrf.mxu1  ;;  %v2784_v57 = vpop.f32.mrf.mxu0 }
 0x259   : > { %v2134_v8 = vadd.f32 %v2782_v6, %v2094_v4 }
 0x272   : > { %v2802_v60 = vpop.f32.mrf.mxu1 }
 0x273   : > { %v2824_v58 = vpop.f32.mrf.mxu0 }
 0x274   : > { %v2803_v61 = vpop.f32.mrf.mxu1 }
 0x275   : > { %v2825_v62 = vpop.f32.mrf.mxu0  ;;  %v2804_v7 = vadd.f32 %v2803_v61, %v2802_v60 }
 0x276   : > { %v2805_v63 = vpop.f32.mrf.mxu1  ;;  %v2826_v11 = vadd.f32 %v2825_v62, %v2824_v58 }
 0x277   : > { %v2827_v0 = vpop.f32.mrf.mxu0  ;;  %v2174_v9 = vadd.f32 %v2804_v7, %v2134_v8 }
 0x278   : > { %v2806_v3 = vpop.f32.mrf.mxu1 }
 0x279   : > { %v2828_v59 = vpop.f32.mrf.mxu0  ;;  %v2214_v14 = vadd.f32 %v2826_v11, %v2174_v9 }
 0x292   : > { %v2846_v10 = vpop.f32.mrf.mxu1 }
 0x293   : > { %v2868_v12 = vpop.f32.mrf.mxu0 }
 0x294   : > { %v2847_v13 = vpop.f32.mrf.mxu1 }
 0x295   : > { %v2848_v15 = vadd.f32 %v2847_v13, %v2846_v10  ;;  %v2869_v16 = vpop.f32.mrf.mxu0 }
 0x296   : > { %v2849_v1 = vpop.f32.mrf.mxu1  ;;  %v2870_v18 = vadd.f32 %v2869_v16, %v2868_v12 }
 0x297   : > { %v2254_v17 = vadd.f32 %v2848_v15, %v2214_v14  ;;  %v2871_v19 = vpop.f32.mrf.mxu0 }
 0x298   : > { %v2850_v21 = vpop.f32.mrf.mxu1 }
 0x299   : > { %v2294_v22 = vadd.f32 %v2870_v18, %v2254_v17  ;;  %v2872_v23 = vpop.f32.mrf.mxu0 }
 0x29b   : > { %v2306_v24 = vadd.f32 %v2685_v20, %v2294_v22 }
 0x29d   : > { %3048 = vtanh.f32 %v2306_v24 }
 0x2a7   :  { %47 = sbr.rel (!%p45_p10) target bundleno = 27 (0x1b), region = 72 }
 0x2aa   : > { %v3049_v25 = vpop.eup %3048 }
 0x2ab   : > { %2687 = vst.msk [vmem:[%s2472_s28 + $0x8] sm:$0xff] %vm41_vm0, %v3049_v25 }
 0x2b2   :  { %v2311_v29 = vld [vmem:[#allocation2] sm:$0xff]  ;;  %v2312_v30 = vld [vmem:[#allocation2 + $0x8] sm:$0xff]  ;;  %v2313_v32 = vld [vmem:[#allocation2 + $0x10] sm:$0xff] }
 0x2b3   :  { %v2315_v31 = vpack.c.bf16 %v2312_v30, %v2311_v29  ;;  %v2314_v33 = vld [vmem:[#allocation2 + $0x18] sm:$0xff] }
 0x2b4   :  { %v2316_v34 = vpack.c.bf16 %v2314_v33, %v2313_v32 }
 0x2b5   :  { %2894 = vmatprep.mubr.msk.bf16.mxu0 %vm41_vm0, %v2315_v31 }
 0x2b6   :  { %2895 = vmatmul.mubr.msk.bf16.vlgmr.msra.gmra.mxu0 %vm41_vm0, %v2316_v34 }
 0x376   :  { %v2896_v36 = vpop.f32.mrf.mxu0 }
 0x377   :  { %v2389_v37 = vadd.f32 %v2896_v36, %v2688_v35 }
 0x378   :  { %v2380_v38 = vpop.f32.mrf.mxu0 }
 0x379   :  { %v2381_v39 = vadd.f32 %v2688_v35, %v2380_v38  ;;  %2399 = vmax.xlane.f32.xlu1 %v2389_v37 }
 0x37a   :  { %v2897_v40 = vpop.f32.mrf.mxu0 }
 0x37b   :  { %v2392_v41 = vadd.f32 %v2897_v40, %v2688_v35  ;;  %2395 = vmax.xlane.f32.xlu0 %v2381_v39 }
 0x37c   :  { %v2383_v42 = vpop.f32.mrf.mxu0 }
 0x37d   :  { %v2384_v27 = vadd.f32 %v2688_v35, %v2383_v42  ;;  %2401 = vmax.xlane.f32.xlu1 %v2392_v41 }
 0x37f   :  { %2397 = vmax.xlane.f32.xlu0 %v2384_v27 }
 0x402   :  { %v2400_v43 = vpop.xlane.xlu1 %2399 }
 0x403   :  { %v2405_v44 = vsub.f32 %v2389_v37, %v2400_v43 }
 0x404   :  { %v2396_v45 = vpop.xlane.xlu0 %2395 }
 0x405   :  { %v2403_v46 = vsub.f32 %v2381_v39, %v2396_v45  ;;  %v2411_v49 = vmul.f32 1.442695, %v2405_v44 }
 0x406   :  { %v2402_v2 = vpop.xlane.xlu1 %2401 }
 0x407   :  { %v2407_v47 = vmul.f32 1.442695, %v2403_v46  ;;  %v2406_v28 = vsub.f32 %v2392_v41, %v2402_v2 }
 0x408   :  { %v2398_v5 = vpop.xlane.xlu0 %2397 }
 0x409   :  { %3052 = vpow2.f32 %v2407_v47  ;;  %v2404_v50 = vsub.f32 %v2384_v27, %v2398_v5  ;;  %v2413_v53 = vmul.f32 1.442695, %v2406_v28 }
 0x40a   :  { %3054 = vpow2.f32 %v2411_v49 }
 0x40b   :  { %v2409_v52 = vmul.f32 1.442695, %v2404_v50 }
 0x40d   :  { %3056 = vpow2.f32 %v2409_v52 }
 0x40e   :  { %3058 = vpow2.f32 %v2413_v53 }
 0x416   :  { %v3053_v54 = vpop.eup %3052 }
 0x417   :  { %2415 = vadd.xlane.f32.xlu0 %v3053_v54  ;;  %v3055_v55 = vpop.eup %3054 }
 0x41a   :  { %v3057_v56 = vpop.eup %3056 }
 0x41b   :  { %2419 = vadd.xlane.f32.xlu0 %v3055_v55  ;;  %2417 = vadd.xlane.f32.xlu1 %v3057_v56  ;;  %v3059_v57 = vpop.eup %3058 }
 0x41f   :  { %2421 = vadd.xlane.f32.xlu1 %v3059_v57 }
 0x4a0   :  { %v2416_v60 = vpop.xlane.xlu0 %2415 }
 0x4a1   :  { %3060 = vlog2.f32 %v2416_v60 }
 0x4a4   :  { %v2418_v58 = vpop.xlane.xlu1 %2417  ;;  %v2420_v61 = vpop.xlane.xlu0 %2419 }
 0x4a5   :  { %3062 = vlog2.f32 %v2418_v58 }
 0x4a6   :  { %3064 = vlog2.f32 %v2420_v61 }
 0x4a8   :  { %v2422_v62 = vpop.xlane.xlu1 %2421 }
 0x4a9   :  { %3066 = vlog2.f32 %v2422_v62 }
 0x4ae   :  { %v3061_v63 = vpop.eup %3060 }
 0x4af   :  { %v2424_v0 = vmul.f32 0.6931472, %v3061_v63 }
 0x4b1   :  { %v2431_v3 = vsub.f32 %v2403_v46, %v2424_v0 }
 0x4b2   :  { %v3063_v59 = vpop.eup %3062 }
 0x4b3   :  { %v3065_v51 = vpop.eup %3064  ;;  %2435 = vst [vmem:[#allocation8] sm:$0xff] %v2431_v3  ;;  %v2426_v4 = vmul.f32 0.6931472, %v3063_v59 }
 0x4b4   :  { %v2428_v6 = vmul.f32 0.6931472, %v3065_v51 }
 0x4b5   :  { %v2432_v7 = vsub.f32 %v2404_v50, %v2426_v4 }
 0x4b6   :  { %v3067_v8 = vpop.eup %3066  ;;  %v2433_v9 = vsub.f32 %v2405_v44, %v2428_v6 }
 0x4b7   :  { %2436 = vst [vmem:[#allocation8 + $0x8] sm:$0xff] %v2432_v7  ;;  %v2430_v10 = vmul.f32 0.6931472, %v3067_v8 }
 0x4b8   :  { %2437 = vst [vmem:[#allocation8 + $0x10] sm:$0xff] %v2433_v9 }
 0x4b9   :  { %v2434_v11 = vsub.f32 %v2406_v28, %v2430_v10 }
 0x4bb   :  { %2438 = vst [vmem:[#allocation8 + $0x18] sm:$0xff] %v2434_v11 }
 0x4bc   :  { %3103 = shalt.err (!%p3100_p1)
}
 0x4bd   :  { %s3132_s8 = smov 128   ;;  %s3133_s19 = smov 8  }
 0x4be   :  { %2450 = dma.vmem_to_hbm [thread:$0]  %s2445_s6, 512, %s4009_s9, [#allocation9], %s3132_s8, %s3132_s8, %s3133_s19  }
 0x4bf   :  { %3118 = dma.done.wait [#allocation9], 512  }
 0x4c0   :  { %3119 = vsyncadd [#allocation9], 4294966784 }
 0x4c1   :  { %2454 = vsyncpa [#allocation9], 1 }

</bundles_post_ra>
